<compile_context>
chip_gen: v7x
topology: tpu7x:2x2x1
jax: 0.10.0
libtpu: 0.0.40
codegen_flags: <defaults>
</compile_context>

<pallas_src>
import jax
import jax.numpy as jnp
import numpy as np
from jax import lax
from jax.experimental import pallas as pl
from jax.experimental.pallas import tpu as pltpu


def _dff_chunk(d_ff):
    """Largest chunk in (512, 256, 128) that divides d_ff (d_ff is a multiple of 128)."""
    for c in (512, 256, 128):
        if d_ff % c == 0:
            return c
    return d_ff


def _switch_ffn_kernel(
    x_ref,       # [tm, d_model]          compute dtype (f32 or bf16)
    wf_ref,      # [d_model, d_ff+n_pad]  fused [W1 | router] weight (compute dtype)
    bf_ref,      # [1, d_ff+n_pad]        fused bias, f32 (pad logits biased to -1e30)
    w2_ref,      # [d_ff, d_model]        compute dtype
    b2_ref,      # [1, d_model]           f32
    out_ref,     # [tm, d_model]          output dtype
    pmax_ref,    # [tm, 1]                f32
    counts_ref,  # [1, 1, n_pad]          f32 per-tile partial
    psum_ref,    # [1, 1, n_pad]          f32 per-tile partial
):
    d_ff, d_model = w2_ref.shape
    chunk = _dff_chunk(d_ff)

    x = x_ref[...]

    # One fused MXU pass: FFN hidden pre-activation and router logits together, f32 acc.
    fused = jnp.dot(x, wf_ref[...], preferred_element_type=jnp.float32) + bf_ref[...]

    # ---- Router: softmax over the (padded) logits block ----
    logits = fused[:, d_ff:]                                     # [tm, n_pad]
    n_pad = logits.shape[-1]
    m = jnp.max(logits, axis=-1, keepdims=True)
    e = jnp.exp(logits - m)                                      # pad cols -> exp(-huge) = 0
    denom = jnp.sum(e, axis=-1, keepdims=True)
    inv = pl.reciprocal(denom, approx=True)                      # EUP slot (free-ish)
    inv = inv * (2.0 - denom * inv)                              # one Newton step -> f32 acc.
    probs = e * inv                                              # [tm, n_pad]
    pmax = jnp.max(probs, axis=-1, keepdims=True)                # [tm, 1]

    # First-occurrence argmax (torch.max semantics).
    expert_ids = lax.broadcasted_iota(jnp.int32, probs.shape, 1)
    first_max = jnp.min(jnp.where(probs >= pmax, expert_ids, n_pad),
                        axis=-1, keepdims=True)                  # [tm, 1]
    onehot = (expert_ids == first_max).astype(jnp.float32)       # [tm, n_pad]

    counts_ref[0] = jnp.sum(onehot, axis=0, keepdims=True)       # [1, n_pad] per-tile partial
    psum_ref[0] = jnp.sum(probs, axis=0, keepdims=True)          # [1, n_pad] per-tile partial

    # ---- Shared-expert FFN (all experts alias the same FeedForward object) ----
    # Chunked over d_ff: relu/cast (VPU) of chunk k+1 overlaps the MXU matmul of chunk k,
    # and the live relu'd slice stays [tm, chunk].  Static unroll; f32 accumulator.
    y = jnp.zeros((x.shape[0], d_model), jnp.float32)
    for k in range(d_ff // chunk):
        lo, hi = k * chunk, (k + 1) * chunk
        hk = jnp.maximum(fused[:, lo:hi], 0.0).astype(w2_ref.dtype)
        y = y + jnp.dot(hk, w2_ref[lo:hi, :], preferred_element_type=jnp.float32)
    y = y + b2_ref[...]

    # is_scale_prob=True: scale each token's output by its max routing probability.
    out_ref[...] = (y * pmax).astype(out_ref.dtype)
    pmax_ref[...] = pmax


def prepare_switch_params(params, compute_dtype=jnp.float32):
    """One-time parameter prep: fused [W1 | router] weight + padded bias, dtype casts.

    Hoisted out of the per-forward path so the d_model x (d_ff + n_pad) concat is not
    re-materialized in HBM on every call.
    """
    ws, bs, w1, b1, w2, b2 = (params["ws"], params["bs"], params["w1"],
                              params["b1"], params["w2"], params["b2"])
    d_model, n_experts = ws.shape
    d_ff = w1.shape[1]
    assert d_ff % 128 == 0, "d_ff must be a multiple of 128 (lane tile)"
    n_pad = 128 * ((n_experts + 127) // 128)   # router block padded to full lane tiles

    # Padded router columns: zero weight + very negative bias -> exactly zero probability
    # and never the argmax.  NOTE: the -1e30 bias MUST stay f32 (bf16 would be -inf).
    ws_pad = jnp.zeros((d_model, n_pad), compute_dtype).at[:, :n_experts].set(
        ws.astype(compute_dtype))
    w_fused = jnp.concatenate([w1.astype(compute_dtype), ws_pad], axis=1)
    bs_pad = jnp.full((1, n_pad), -1e30, jnp.float32).at[:, :n_experts].set(
        bs.astype(jnp.float32))
    b_fused = jnp.concatenate([b1.astype(jnp.float32), bs_pad], axis=1)

    return dict(
        w_fused=w_fused, b_fused=b_fused,
        w2=w2.astype(compute_dtype), b2=b2.astype(jnp.float32),
        n_experts=n_experts, d_ff=d_ff, d_model=d_model, n_pad=n_pad,
        compute_dtype=jnp.dtype(compute_dtype),
    )


def switch_feed_forward(x, prep, *, tm=512):
    """x: [seq_len, batch, d_model]; prep: prepare_switch_params(...) output.

    Returns (out, counts, prob_sum, n_dropped, route_prob_max).
    """
    seq_len, batch, d_model = x.shape
    assert d_model == prep["d_model"]
    N = seq_len * batch

    cdtype = prep["compute_dtype"]
    out_dtype = x.dtype
    n_experts, d_ff, n_pad = prep["n_experts"], prep["d_ff"], prep["n_pad"]
    assert prep["b_fused"].dtype == jnp.float32, "pad-bias trick requires f32 fused bias"

    sub = 16 if (cdtype == jnp.bfloat16 or out_dtype == jnp.bfloat16) else 8
    tm = min(tm, N)
    assert N % tm == 0 and tm % sub == 0, "token count must tile evenly"
    # v7x megacore: prefer >= 4 tiles on the parallel token axis so the two TensorCores
    # load-balance; halve tm while the tiling stays legal.
    while (N // tm < 4 and tm % 2 == 0 and (tm // 2) % sub == 0 and N % (tm // 2) == 0):
        tm //= 2
    num_tiles = N // tm

    x_flat = x.reshape(N, d_model).astype(cdtype)

    isz = jnp.dtype(cdtype).itemsize
    osz = jnp.dtype(out_dtype).itemsize
    chunk = _dff_chunk(d_ff)

    # ---- VMEM budget ----
    # Constant weights/biases: single-buffered (pl.Buffered(1) below).
    w_bytes = (d_model * (d_ff + n_pad) + d_ff * d_model) * isz + ((d_ff + n_pad) + d_model) * 4
    # Per-tile streamed I/O: double-buffered by the pipeline.
    t_bytes = tm * d_model * (isz + osz) + tm * 4 + 2 * n_pad * 4
    # In-kernel live intermediates: fused f32, one relu'd h chunk, f32 accumulator,
    # softmax temporaries (e / probs / onehot).
    i_bytes = (tm * (d_ff + n_pad) * 4 + tm * chunk * isz + tm * d_model * 4
               + 3 * tm * n_pad * 4)
    budget = w_bytes + 2 * t_bytes + i_bytes + (8 << 20)   # + headroom for Mosaic scratch
    try:
        phys_vmem = getattr(pltpu.get_tpu_info(), "vmem_capacity_bytes", 128 << 20)
    except Exception:
        phys_vmem = 128 << 20
    # Leave headroom below physical VMEM: ~48 MiB on v7x (64 MiB/TC), ~100 MiB on v5e/v6e.
    cap = (48 << 20) if phys_vmem <= (64 << 20) else (100 << 20)
    vmem_limit = int(min(max(budget, 32 << 20), cap))

    # ---- Cost estimate (helps XLA overlap the wrapper-side reductions / next layer) ----
    flops = 2 * N * d_model * (d_ff + n_pad) + 2 * N * d_ff * d_model
    transcendentals = N * n_pad
    bytes_accessed = (w_bytes + N * d_model * (isz + osz) + N * 4
                      + 2 * num_tiles * n_pad * 4)

    const = lambda ndim: (lambda t: (0,) * ndim)
    single = pl.Buffered(1)   # constant index_map -> never re-DMA'd -> one VMEM copy

    out, pmax, counts_part, psum_part = pl.pallas_call(
        _switch_ffn_kernel,
        out_shape=(
            jax.ShapeDtypeStruct((N, d_model), out_dtype),
            jax.ShapeDtypeStruct((N, 1), jnp.float32),
            jax.ShapeDtypeStruct((num_tiles, 1, n_pad), jnp.float32),
            jax.ShapeDtypeStruct((num_tiles, 1, n_pad), jnp.float32),
        ),
        grid_spec=pltpu.PrefetchScalarGridSpec(
            num_scalar_prefetch=0,
            grid=(num_tiles,),
            in_specs=[
                pl.BlockSpec((tm, d_model), lambda t: (t, 0)),                     # x tile
                pl.BlockSpec((d_model, d_ff + n_pad), const(2), pipeline_mode=single),
                pl.BlockSpec((1, d_ff + n_pad), const(2), pipeline_mode=single),
                pl.BlockSpec((d_ff, d_model), const(2), pipeline_mode=single),
                pl.BlockSpec((1, d_model), const(2), pipeline_mode=single),
            ],
            out_specs=[
                pl.BlockSpec((tm, d_model), lambda t: (t, 0)),       # final output tile
                pl.BlockSpec((tm, 1), lambda t: (t, 0)),             # route_prob_max tile
                pl.BlockSpec((1, 1, n_pad), lambda t: (t, 0, 0)),    # counts partial
                pl.BlockSpec((1, 1, n_pad), lambda t: (t, 0, 0)),    # prob-sum partial
            ],
        ),
        compiler_params=pltpu.CompilerParams(
            dimension_semantics=("parallel",),   # per-tile outputs -> megacore-friendly
            vmem_limit_bytes=vmem_limit,
        ),
        cost_estimate=pl.CostEstimate(
            flops=flops, transcendentals=transcendentals, bytes_accessed=bytes_accessed),
    )(x_flat, prep["w_fused"], prep["b_fused"], prep["w2"], prep["b2"])

    final_output = out.reshape(seq_len, batch, d_model)
    # Integer-exact reduction of the per-tile count partials (each partial <= tm < 2^24).
    counts = counts_part.reshape(num_tiles, n_pad).astype(jnp.int32).sum(0)[:n_experts]
    prob_sum = psum_part.reshape(num_tiles, n_pad).sum(0)[:n_experts]
    route_prob_max = pmax.reshape(N)
    n_dropped = 0   # drop_tokens=False
    return (final_output, counts.astype(jnp.float32), prob_sum, n_dropped, route_prob_max)


def _reference(x, params):
    """Pure-JAX f32 reference for correctness checking."""
    seq_len, batch, d_model = x.shape
    xf = x.reshape(-1, d_model).astype(jnp.float32)
    logits = xf @ params["ws"] + params["bs"][0]
    probs = jax.nn.softmax(logits, axis=-1)
    pmax = jnp.max(probs, axis=-1)
    routes = jnp.argmax(probs, axis=-1)
    n_experts = params["ws"].shape[1]
    counts = jnp.sum(jax.nn.one_hot(routes, n_experts, dtype=jnp.float32), axis=0)
    h = jnp.maximum(xf @ params["w1"] + params["b1"][0], 0.0)
    y = h @ params["w2"] + params["b2"][0]
    out = (y * pmax[:, None]).reshape(seq_len, batch, d_model)
    return out, counts, probs.sum(0), pmax


if __name__ == "__main__":
    # Small, TPU-friendly shapes consistent with the module's forward: x is [seq, batch, d_model].
    seq_len, batch, d_model, d_ff, n_experts = 32, 16, 128, 256, 8

    key = jax.random.PRNGKey(0)
    kx, kws, kbs, kw1, kb1, kw2, kb2 = jax.random.split(key, 7)

    x = jax.random.normal(kx, (seq_len, batch, d_model), dtype=jnp.float32)
    # Deterministic params (shapes follow nn.Linear in the module; stored pre-transposed).
    params = {
        "ws": jax.random.normal(kws, (d_model, n_experts), jnp.float32) / np.sqrt(d_model),
        "bs": jax.random.normal(kbs, (1, n_experts), jnp.float32) * 0.01,
        "w1": jax.random.normal(kw1, (d_model, d_ff), jnp.float32) / np.sqrt(d_model),
        "b1": jax.random.normal(kb1, (1, d_ff), jnp.float32) * 0.01,
        "w2": jax.random.normal(kw2, (d_ff, d_model), jnp.float32) / np.sqrt(d_ff),
        "b2": jax.random.normal(kb2, (1, d_model), jnp.float32) * 0.01,
    }

    ref_out, ref_counts, ref_psum, ref_pmax = _reference(x, params)

    # ---- f32 path: tight check (tolerance mildly relaxed for the approx-reciprocal +
    #      fused/chunked-matmul accumulation order; routing counts must match exactly) ----
    prep_f32 = prepare_switch_params(params, jnp.float32)
    out, counts, prob_sum, n_dropped, pmax = jax.block_until_ready(
        switch_feed_forward(x, prep_f32, tm=512))
    np.testing.assert_allclose(np.asarray(out), np.asarray(ref_out), rtol=1e-4, atol=1e-4)
    np.testing.assert_allclose(np.asarray(counts), np.asarray(ref_counts), rtol=0, atol=0)
    np.testing.assert_allclose(np.asarray(prob_sum), np.asarray(ref_psum), rtol=1e-4, atol=1e-4)
    np.testing.assert_allclose(np.asarray(pmax), np.asarray(ref_pmax), rtol=1e-4, atol=1e-4)
    assert n_dropped == 0

    # ---- bf16 path: native MXU input dtype; loose check (near-tie routing may flip) ----
    prep_bf16 = prepare_switch_params(params, jnp.bfloat16)
    out_bf, counts_bf, psum_bf, nd_bf, pmax_bf = jax.block_until_ready(
        switch_feed_forward(x.astype(jnp.bfloat16), prep_bf16, tm=512))
    assert out_bf.shape == (seq_len, batch, d_model) and out_bf.dtype == jnp.bfloat16
    assert int(np.asarray(counts_bf).sum()) == seq_len * batch and nd_bf == 0
    np.testing.assert_allclose(np.asarray(out_bf.astype(jnp.float32)),
                               np.asarray(ref_out), rtol=1e-1, atol=1e-1)

    # ---- v5e-style path: f32 I/O with bf16 MXU operands; loose check ----
    out_mx, counts_mx, psum_mx, nd_mx, pmax_mx = jax.block_until_ready(
        switch_feed_forward(x, prep_bf16, tm=512))
    assert out_mx.dtype == jnp.float32
    assert int(np.asarray(counts_mx).sum()) == seq_len * batch and nd_mx == 0
    np.testing.assert_allclose(np.asarray(out_mx), np.asarray(ref_out), rtol=1e-1, atol=1e-1)

    print("KERNEL_OK")
</pallas_src>

<mosaic_0001>
module attributes {stable_mosaic.version = 11 : i64} {
  func.func @_switch_ffn_kernel(%arg0: i32, %arg1: memref<128x128xf32, #tpu.memory_space<vmem>>, %arg2: memref<128x384xf32, #tpu.memory_space<vmem>>, %arg3: memref<1x384xf32, #tpu.memory_space<vmem>>, %arg4: memref<256x128xf32, #tpu.memory_space<vmem>>, %arg5: memref<1x128xf32, #tpu.memory_space<vmem>>, %arg6: memref<128x128xf32, #tpu.memory_space<vmem>>, %arg7: memref<128x1xf32, #tpu.memory_space<vmem>>, %arg8: memref<1x1x128xf32, #tpu.memory_space<vmem>>, %arg9: memref<1x1x128xf32, #tpu.memory_space<vmem>>) attributes {dimension_semantics = [#tpu.dimension_semantics<parallel>], iteration_bounds = array<i64: 4>, scalar_prefetch = 0 : i64, scratch_operands = 0 : i64, tpu.core_type = #tpu.core_type<tc>, window_params = [{transform_indices = @transform_0, window_bounds = array<i64: 128, 128>}, {pipeline_mode = #tpu.pipeline_mode<synchronous>, transform_indices = @transform_1, window_bounds = array<i64: 128, 384>}, {pipeline_mode = #tpu.pipeline_mode<synchronous>, transform_indices = @transform_2, window_bounds = array<i64: 1, 384>}, {pipeline_mode = #tpu.pipeline_mode<synchronous>, transform_indices = @transform_3, window_bounds = array<i64: 256, 128>}, {pipeline_mode = #tpu.pipeline_mode<synchronous>, transform_indices = @transform_4, window_bounds = array<i64: 1, 128>}, {transform_indices = @transform_5, window_bounds = array<i64: 128, 128>}, {transform_indices = @transform_6, window_bounds = array<i64: 128, 1>}, {transform_indices = @transform_7, window_bounds = array<i64: 1, 1, 128>}, {transform_indices = @transform_8, window_bounds = array<i64: 1, 1, 128>}]} {
    %c0 = arith.constant 0 : index
    %c0_0 = arith.constant 0 : index
    %0 = vector.load %arg1[%c0, %c0_0] : memref<128x128xf32, #tpu.memory_space<vmem>>, vector<128x128xf32>
    %c0_1 = arith.constant 0 : index
    %c0_2 = arith.constant 0 : index
    %1 = vector.load %arg2[%c0_1, %c0_2] : memref<128x384xf32, #tpu.memory_space<vmem>>, vector<128x384xf32>
    %cst = arith.constant dense<0.000000e+00> : vector<128x384xf32>
    %2 = tpu.matmul %0, %1, %cst {dimension_numbers = #tpu.dot_dimension_numbers<[1], [0], [0], [1], [0, 0, 1, 1], [], []>} : vector<128x128xf32>, vector<128x384xf32>, vector<128x384xf32> -> vector<128x384xf32>
    %c0_3 = arith.constant 0 : index
    %c0_4 = arith.constant 0 : index
    %3 = vector.load %arg3[%c0_3, %c0_4] : memref<1x384xf32, #tpu.memory_space<vmem>>, vector<1x384xf32>
    %4 = vector.broadcast %3 : vector<1x384xf32> to vector<128x384xf32>
    %5 = arith.addf %2, %4 : vector<128x384xf32>
    %6 = vector.extract_strided_slice %5 {offsets = [0, 256], sizes = [128, 128], strides = [1, 1]} : vector<128x384xf32> to vector<128x128xf32>
    %cst_5 = arith.constant dense<0xFF800000> : vector<128xf32>
    %7 = vector.multi_reduction <maximumf>, %6, %cst_5 [1] : vector<128x128xf32> to vector<128xf32>
    %8 = vector.shape_cast %7 : vector<128xf32> to vector<128x1xf32>
    %9 = vector.broadcast %8 : vector<128x1xf32> to vector<128x128xf32>
    %10 = arith.subf %6, %9 : vector<128x128xf32>
    %11 = math.exp %10 : vector<128x128xf32>
    %cst_6 = arith.constant dense<0.000000e+00> : vector<128xf32>
    %12 = vector.multi_reduction <add>, %11, %cst_6 [1] : vector<128x128xf32> to vector<128xf32>
    %13 = vector.shape_cast %12 : vector<128xf32> to vector<128x1xf32>
    %14 = tpu.reciprocal %13 {approx = true} : vector<128x1xf32> -> vector<128x1xf32>
    %15 = arith.mulf %13, %14 : vector<128x1xf32>
    %cst_7 = arith.constant 2.000000e+00 : f32
    %16 = vector.broadcast %cst_7 : f32 to vector<128x1xf32>
    %17 = arith.subf %16, %15 : vector<128x1xf32>
    %18 = arith.mulf %14, %17 : vector<128x1xf32>
    %19 = vector.broadcast %18 : vector<128x1xf32> to vector<128x128xf32>
    %20 = arith.mulf %11, %19 : vector<128x128xf32>
    %cst_8 = arith.constant dense<0xFF800000> : vector<128xf32>
    %21 = vector.multi_reduction <maximumf>, %20, %cst_8 [1] : vector<128x128xf32> to vector<128xf32>
    %22 = vector.shape_cast %21 : vector<128xf32> to vector<128x1xf32>
    %23 = tpu.iota {dimensions = array<i32: 1>} : vector<128x128xi32>
    %24 = vector.broadcast %22 : vector<128x1xf32> to vector<128x128xf32>
    %25 = arith.cmpf oge, %20, %24 : vector<128x128xf32>
    %c128_i32 = arith.constant 128 : i32
    %26 = vector.broadcast %c128_i32 : i32 to vector<128x128xi32>
    %27 = arith.select %25, %23, %26 : vector<128x128xi1>, vector<128x128xi32>
    %cst_9 = arith.constant dense<2147483647> : vector<128xi32>
    %28 = vector.multi_reduction <minsi>, %27, %cst_9 [1] : vector<128x128xi32> to vector<128xi32>
    %29 = vector.shape_cast %28 : vector<128xi32> to vector<128x1xi32>
    %30 = vector.broadcast %29 : vector<128x1xi32> to vector<128x128xi32>
    %31 = arith.cmpi eq, %23, %30 : vector<128x128xi32>
    %32 = arith.extui %31 : vector<128x128xi1> to vector<128x128xi32>
    %33 = arith.sitofp %32 : vector<128x128xi32> to vector<128x128xf32>
    %cst_10 = arith.constant dense<0.000000e+00> : vector<128xf32>
    %34 = vector.multi_reduction <add>, %33, %cst_10 [0] : vector<128x128xf32> to vector<128xf32>
    %35 = vector.shape_cast %34 : vector<128xf32> to vector<1x128xf32>
    %c0_11 = arith.constant 0 : index
    %c0_12 = arith.constant 0 : index
    %c0_13 = arith.constant 0 : index
    %36 = vector.load %arg8[%c0_11, %c0_12, %c0_13] : memref<1x1x128xf32, #tpu.memory_space<vmem>>, vector<1x1x128xf32>
    %37 = vector.shape_cast %36 : vector<1x1x128xf32> to vector<1x128xf32>
    %38 = vector.shape_cast %35 : vector<1x128xf32> to vector<1x1x128xf32>
    tpu.vector_store %arg8[%c0_11, %c0_12, %c0_13], %38 {strides = array<i32>} : memref<1x1x128xf32, #tpu.memory_space<vmem>>, vector<1x1x128xf32>,
    %cst_14 = arith.constant dense<0.000000e+00> : vector<128xf32>
    %39 = vector.multi_reduction <add>, %20, %cst_14 [0] : vector<128x128xf32> to vector<128xf32>
    %40 = vector.shape_cast %39 : vector<128xf32> to vector<1x128xf32>
    %c0_15 = arith.constant 0 : index
    %c0_16 = arith.constant 0 : index
    %c0_17 = arith.constant 0 : index
    %41 = vector.load %arg9[%c0_15, %c0_16, %c0_17] : memref<1x1x128xf32, #tpu.memory_space<vmem>>, vector<1x1x128xf32>
    %42 = vector.shape_cast %41 : vector<1x1x128xf32> to vector<1x128xf32>
    %43 = vector.shape_cast %40 : vector<1x128xf32> to vector<1x1x128xf32>
    tpu.vector_store %arg9[%c0_15, %c0_16, %c0_17], %43 {strides = array<i32>} : memref<1x1x128xf32, #tpu.memory_space<vmem>>, vector<1x1x128xf32>,
    %cst_18 = arith.constant 0.000000e+00 : f32
    %44 = vector.broadcast %cst_18 : f32 to vector<128x128xf32>
    %45 = vector.extract_strided_slice %5 {offsets = [0, 0], sizes = [128, 256], strides = [1, 1]} : vector<128x384xf32> to vector<128x256xf32>
    %cst_19 = arith.constant 0.000000e+00 : f32
    %46 = vector.broadcast %cst_19 : f32 to vector<128x256xf32>
    %47 = arith.maximumf %45, %46 : vector<128x256xf32>
    %c0_20 = arith.constant 0 : index
    %c0_21 = arith.constant 0 : index
    %48 = vector.load %arg4[%c0_20, %c0_21] : memref<256x128xf32, #tpu.memory_space<vmem>>, vector<256x128xf32>
    %cst_22 = arith.constant dense<0.000000e+00> : vector<128x128xf32>
    %49 = tpu.matmul %47, %48, %cst_22 {dimension_numbers = #tpu.dot_dimension_numbers<[1], [0], [0], [1], [0, 0, 1, 1], [], []>} : vector<128x256xf32>, vector<256x128xf32>, vector<128x128xf32> -> vector<128x128xf32>
    %50 = arith.addf %44, %49 : vector<128x128xf32>
    %c0_23 = arith.constant 0 : index
    %c0_24 = arith.constant 0 : index
    %51 = vector.load %arg5[%c0_23, %c0_24] : memref<1x128xf32, #tpu.memory_space<vmem>>, vector<1x128xf32>
    %52 = vector.broadcast %51 : vector<1x128xf32> to vector<128x128xf32>
    %53 = arith.addf %50, %52 : vector<128x128xf32>
    %54 = vector.broadcast %22 : vector<128x1xf32> to vector<128x128xf32>
    %55 = arith.mulf %53, %54 : vector<128x128xf32>
    %c0_25 = arith.constant 0 : index
    %c0_26 = arith.constant 0 : index
    %56 = vector.load %arg6[%c0_25, %c0_26] : memref<128x128xf32, #tpu.memory_space<vmem>>, vector<128x128xf32>
    tpu.vector_store %arg6[%c0_25, %c0_26], %55 {strides = array<i32>} : memref<128x128xf32, #tpu.memory_space<vmem>>, vector<128x128xf32>,
    %c0_27 = arith.constant 0 : index
    %c0_28 = arith.constant 0 : index
    %57 = vector.load %arg7[%c0_27, %c0_28] : memref<128x1xf32, #tpu.memory_space<vmem>>, vector<128x1xf32>
    tpu.vector_store %arg7[%c0_27, %c0_28], %22 {strides = array<i32>} : memref<128x1xf32, #tpu.memory_space<vmem>>, vector<128x1xf32>,
    return
  }
  func.func @transform_0(%arg0: i32) -> (i32, i32) {
    %c0_i32 = arith.constant 0 : i32
    %c0_i32_0 = arith.constant 0 : i32
    return %arg0, %c0_i32 : i32, i32
  }
  func.func @transform_1(%arg0: i32) -> (i32, i32) {
    %c0_i32 = arith.constant 0 : i32
    %c0_i32_0 = arith.constant 0 : i32
    %c0_i32_1 = arith.constant 0 : i32
    return %c0_i32, %c0_i32_0 : i32, i32
  }
  func.func @transform_2(%arg0: i32) -> (i32, i32) {
    %c0_i32 = arith.constant 0 : i32
    %c0_i32_0 = arith.constant 0 : i32
    %c0_i32_1 = arith.constant 0 : i32
    return %c0_i32, %c0_i32_0 : i32, i32
  }
  func.func @transform_3(%arg0: i32) -> (i32, i32) {
    %c0_i32 = arith.constant 0 : i32
    %c0_i32_0 = arith.constant 0 : i32
    %c0_i32_1 = arith.constant 0 : i32
    return %c0_i32, %c0_i32_0 : i32, i32
  }
  func.func @transform_4(%arg0: i32) -> (i32, i32) {
    %c0_i32 = arith.constant 0 : i32
    %c0_i32_0 = arith.constant 0 : i32
    %c0_i32_1 = arith.constant 0 : i32
    return %c0_i32, %c0_i32_0 : i32, i32
  }
  func.func @transform_5(%arg0: i32) -> (i32, i32) {
    %c0_i32 = arith.constant 0 : i32
    %c0_i32_0 = arith.constant 0 : i32
    return %arg0, %c0_i32 : i32, i32
  }
  func.func @transform_6(%arg0: i32) -> (i32, i32) {
    %c0_i32 = arith.constant 0 : i32
    %c0_i32_0 = arith.constant 0 : i32
    return %arg0, %c0_i32 : i32, i32
  }
  func.func @transform_7(%arg0: i32) -> (i32, i32, i32) {
    %c0_i32 = arith.constant 0 : i32
    %c0_i32_0 = arith.constant 0 : i32
    %c0_i32_1 = arith.constant 0 : i32
    return %arg0, %c0_i32, %c0_i32_0 : i32, i32, i32
  }
  func.func @transform_8(%arg0: i32) -> (i32, i32, i32) {
    %c0_i32 = arith.constant 0 : i32
    %c0_i32_0 = arith.constant 0 : i32
    %c0_i32_1 = arith.constant 0 : i32
    return %arg0, %c0_i32, %c0_i32_0 : i32, i32, i32
  }
}

</mosaic_0001>

<bundles_post_ra>
// kernel: tpu_custom_call.1
= control target key start
LH: loop header
LB: loop body
LE: loop exit
PB: predicated region body
PF: predicated region fallthrough
CT: control target
= control target key end

     0   :  { %14 = vsyncpa [#allocation3], 0  ;;  %s3652_s0 = inlined_call_operand.hbm [shape: f32[512,128], index: 0, kind: input, shape index: {}]   ;;  %s3653_s1 = inlined_call_operand.hbm [shape: f32[128,384], index: 1, kind: input, shape index: {}]   ;;  %s3654_s2 = inlined_call_operand.vmem [shape: f32[1,384], index: 2, kind: input, shape index: {}]   ;;  %s3655_s3 = inlined_call_operand.hbm [shape: f32[256,128], index: 3, kind: input, shape index: {}]   ;;  %s3656_s4 = inlined_call_operand.vmem [shape: f32[1,128], index: 4, kind: input, shape index: {}]   ;;  %s3657_s5 = inlined_call_operand.hbm [shape: f32[512,128], index: 5, kind: output, shape index: {0}]   ;;  %s3658_s6 = inlined_call_operand.vmem [shape: f32[512,1], index: 6, kind: output, shape index: {1}]   ;;  %s3659_s7 = inlined_call_operand.hbm [shape: f32[4,1,128], index: 7, kind: output, shape index: {2}]   ;;  %s3660_s8 = inlined_call_operand.hbm [shape: f32[4,1,128], index: 8, kind: output, shape index: {3}]  }
   0x1   :  { %16 = vsyncpa [#allocation3 + $0x1], 0 }
   0x2   :  { %17 = vsyncpa [#allocation6], 0 }
   0x3   :  { %18 = vsyncpa [#allocation4], 0 }
   0x4   :  { %20 = vsyncpa [#allocation4 + $0x1], 0 }
   0x5   :  { %21 = vsyncpa [#allocation10], 0 }
   0x6   :  { %23 = vsyncpa [#allocation10 + $0x1], 0  ;;  %s2582_s27 = smov 0   ;;  %s2584_s28 = smov 0  }
   0x7   :  { %s2586_s29 = smov 0   ;;  %s2588_s30 = smov 0  }
   0x8 LB: > { %s2603_s9 = sadd.s32 4294967295, %s2522_s30   ;;  %s3664_s10 = sadd.s32 4294967294, %s2522_s30   ;;  %s2522_s30 = sphi %s2588_s30, %s3687_s30   ;;  %s2518_s29 = sphi %s2586_s29, %s3686_s29   ;;  %s2514_s28 = sphi %s2584_s28, %s3685_s28   ;;  %s2510_s27 = sphi %s2582_s27, %s3684_s27  }
   0x9   : > { %p49_p0 = scmp.ne.s32.totalorder %s2514_s28, %s2510_s27  ;;  %p3661_p1 = scmp.eq.s32.totalorder %s2603_s9, 0 }
   0xa   : > { %p163_p3 = scmp.eq.s32.totalorder %s3664_s10, 3  ;;  %p1838_p5 = scmp.ge.s32.totalorder %s2522_s30, 1 }
   0xb   : > { %p2614_p4 = por %p3661_p1, %p49_p0  ;;  %p248_p7 = scmp.lt.s32.totalorder %s2522_s30, 5 }
   0xc   : > { %p2619_p6 = por %p163_p3, %p49_p0  ;;  %s2524_s14 = smov [#allocation5]  }
   0xd   : > { %s3668_s11 = scalar_select %p2614_p4, 1, 0 }
   0xe   : > { %s3669_s12 = scalar_select %p2619_p6, 1, 0 }
   0xf   : > { %p2624_p8 = pnand %p1838_p5, %p248_p7  ;;  %s260_s15 = sshll.u32 %s2524_s14, 4  ;;  %s261_s15 = int_to_ptr.vmem [resolvable:$true] %s260_s15 }
  0x10   : > { %s2525_s17 = smov [#allocation7]   ;;  %s2306_s21 = scalar_lea.hbm %s3653_s1, 6144 }
  0x11   : > { %s3670_s13 = scalar_select %p2624_p8, 1, 0 }
  0x12   : > { %p2174_p9 = pneg %p2624_p8  ;;  %s276_s18 = sshll.u32 %s2525_s17, 4  ;;  %s2636_s18 = int_to_ptr.vmem [resolvable:$true] %s276_s18 }
  0x13   : > { %p2307_p11 = scmp.ne.s32.totalorder %s3653_s1, %s2306_s21  ;;  %p2313_p3 = scmp.lt.u32.totalorder %s2306_s21, %s3653_s1 }
  0x14   : > { %p2632_p10 = pnand %p2174_p9, %p3661_p1 }
  0x16   : > { %p2308_p12 = pneg %p2632_p10 }
  0x18   : > { %p2309_p13 = pnand %p2308_p12, %p2307_p11 }
  0x1a   : > { %p2310_p0 = pneg %p2309_p13 }
  0x1c   : > { %p2315_p5 = pnand %p2313_p3, %p2310_p0 }
  0x1e   : > { %2318 = shalt.err (!%p2315_p5)
}
  0x1f   : > { %s2319_s26 = scalar_lea.vmem %s261_s15, 6144  ;;  %p2327_p2 = scmp.lt.s32.totalorder %s261_s15, %s261_s15 }
  0x20   : > { %p2320_p7 = scmp.ne.s32.totalorder %s261_s15, %s2319_s26  ;;  %p2328_p6 = scmp.lt.s32.totalorder %s2319_s26, %s2319_s26 }
  0x22   : > { %p2322_p9 = pnand %p2320_p7, %p2308_p12  ;;  %p2329_p4 = por %p2328_p6, %p2327_p2 }
  0x24   : > { %p2323_p1 = pneg %p2322_p9 }
  0x26   : > { %p2330_p8 = pnand %p2329_p4, %p2323_p1 }
  0x28   : > { %2333 = shalt.err (!%p2330_p8)
}
  0x29   : > { %s2526_s14 = smov 384   ;;  %s2527_s17 = smov 24  }
  0x2a   : > { %2177 = dma.hbm_to_vmem [thread:$0]  (!%p2632_p10), %s3653_s1, 6144, %s261_s15, [#allocation6], %s2526_s14, %s2526_s14, %s2527_s17  }
  0x2b   : > { %s2334_s23 = scalar_lea.hbm %s3655_s3, 4096 }
  0x2c   : > { %p2335_p11 = scmp.ne.s32.totalorder %s3655_s3, %s2334_s23  ;;  %p2341_p4 = scmp.lt.u32.totalorder %s2334_s23, %s3655_s3 }
  0x2e   : > { %p2337_p1 = pnand %p2335_p11, %p2308_p12 }
  0x30   : > { %p2338_p2 = pneg %p2337_p1 }
  0x32   : > { %p2343_p6 = pnand %p2341_p4, %p2338_p2 }
  0x34   : > { %2346 = shalt.err (!%p2343_p6)
}
  0x35   : > { %s2347_s15 = scalar_lea.vmem %s2636_s18, 4096  ;;  %p2355_p3 = scmp.lt.s32.totalorder %s2636_s18, %s2636_s18 }
  0x36   : > { %p2348_p8 = scmp.ne.s32.totalorder %s2636_s18, %s2347_s15  ;;  %p2356_p5 = scmp.lt.s32.totalorder %s2347_s15, %s2347_s15 }
  0x38   : > { %p2350_p13 = pnand %p2348_p8, %p2308_p12  ;;  %p2357_p7 = por %p2356_p5, %p2355_p3 }
  0x3a   : > { %p2351_p0 = pneg %p2350_p13 }
  0x3c   : > { %p2358_p9 = pnand %p2357_p7, %p2351_p0 }
  0x3e   : > { %2361 = shalt.err (!%p2358_p9)
}
  0x3f   : > { %s3665_s10 = smov 128   ;;  %s3666_s14 = smov 8  }
  0x40   : > { %2180 = dma.hbm_to_vmem [thread:$0]  (!%p2632_p10), %s3655_s3, 4096, %s2636_s18, [#allocation6], %s3665_s10, %s3665_s10, %s3666_s14  }
  0x41   : > { %s2689_s20 = sadd.s32 1, %s2522_s30   ;;  %s36_s22 = sadd.s32 1, %s2518_s29 }
  0x42   : > { %s33_s21 = ssub.s32 %s2522_s30, %s2689_s20  ;;  %p43_p11 = scmp.ne.s32.totalorder %s2518_s29, %s2514_s28 }
  0x43   : > { %p34_p12 = scmp.eq.s32.totalorder %s33_s21, 0  ;;  %p44_p1 = scmp.eq.s32.totalorder %s2522_s30, 0 }
  0x44   : > { %p3672_p4 = scmp.eq.s32.totalorder %s2603_s9, 3  ;;  %p2197_p8 = scmp.lt.s32.totalorder %s2522_s30, 4 }
  0x45   : > { %s2698_s23 = scalar_select %p34_p12, %s2518_s29, %s36_s22  }
  0x46   : > { %p45_p2 = por %p44_p1, %p43_p11  ;;  %p2702_p6 = por %p3672_p4, %p43_p11 }
  0x47   : > { %s293_s24 = sand.u32 1, %s2518_s29   ;;  %s1876_s18 = sshll.u32 %s2522_s30, 11 }
  0x48   : > { %s1842_s25 = sshll.u32 %s293_s24, 7  ;;  %s2712_s17 = scalar_lea.hbm %s3652_s0, %s1876_s18 }
  0x49   : > { %s297_s19 = scalar_lea.vmem [#allocation2], %s1842_s25  ;;  %p2716_p10 = pnand %p2197_p8, %p45_p2 }
  0x4a   : > { %s304_s21 = sshll.u32 %s297_s19, 4  ;;  %s2720_s10 = scalar_lea.sflag [#allocation3], %s293_s24  ;;  %s2714_s21 = int_to_ptr.vmem [resolvable:$true] %s304_s21 }
  0x4b   : > { %s2362_s14 = scalar_lea.hbm %s2712_s17, 2048  ;;  %p2364_p0 = pneg %p2716_p10 }
  0x4c   : > { %p2363_p13 = scmp.ne.s32.totalorder %s2712_s17, %s2362_s14  ;;  %s2367_s26 = scalar_lea.hbm %s3652_s0, 8192 }
  0x4d   : > { %p2368_p7 = scmp.lt.u32.totalorder %s2712_s17, %s3652_s0  ;;  %p2369_p9 = scmp.lt.u32.totalorder %s2367_s26, %s2362_s14 }
  0x4e   : > { %p2365_p3 = pnand %p2364_p0, %p2363_p13  ;;  %p2371_p11 = scmp.lt.u32.totalorder %s2362_s14, %s2712_s17 }
  0x4f   : > { %p2370_p12 = por %p2369_p9, %p2368_p7 }
  0x50   : > { %p2366_p5 = pneg %p2365_p3 }
  0x51   : > { %p2372_p1 = por %p2371_p11, %p2370_p12 }
  0x53   : > { %p2373_p2 = pnand %p2372_p1, %p2366_p5 }
  0x55   : > { %2376 = shalt.err (!%p2373_p2)
}
  0x56   : > { %s2377_s24 = scalar_lea.vmem %s2714_s21, 2048  ;;  %s2530_s25 = smov [#allocation2]  }
  0x57   : > { %p2378_p4 = scmp.ne.s32.totalorder %s2714_s21, %s2377_s24  ;;  %s2382_s18 = sshll.u32 %s2530_s25, 4  ;;  %s2383_s18 = int_to_ptr.vmem [resolvable:$false] %s2382_s18 }
  0x58   : > { %s2384_s15 = scalar_lea.vmem %s2383_s18, 4096  ;;  %p2385_p3 = scmp.lt.s32.totalorder %s2714_s21, %s2383_s18 }
  0x59   : > { %p2380_p8 = pnand %p2378_p4, %p2364_p0  ;;  %p2386_p7 = scmp.lt.s32.totalorder %s2384_s15, %s2377_s24 }
  0x5b   : > { %p2381_p13 = pneg %p2380_p8  ;;  %p2387_p9 = por %p2386_p7, %p2385_p3 }
  0x5d   : > { %p2388_p12 = pnand %p2387_p9, %p2381_p13 }
  0x5f   : > { %2391 = shalt.err (!%p2388_p12)
}
  0x60   : > { %s3675_s14 = smov 8   ;;  %s3676_s26 = smov 128  }
  0x61   : > { %2184 = dma.hbm_to_vmem [thread:$0]  (!%p2716_p10), %s2712_s17, 2048, %s2714_s21, %s2720_s10, %s3676_s26, %s3676_s26, %s3675_s14  }
  0x62   : > { %p3677_p0 = scmp.ne.s32.totalorder %s3670_s13, 0 }
  0x63   : > { %s2754_s19 = sand.u32 (!%p3677_p0), 1, %s2514_s28   ;;  %p3678_p5 = scmp.ne.s32.totalorder (!%p3677_p0), %s3668_s11, 0 }
  0x64   : > { %316 = sbr.rel (%p3677_p0) target bundleno = 1202 (0x4b2), region = 40  ;;  %s1846_s24 = sshll.u32 (!%p3677_p0), %s2754_s19, 7 }
  0x65   : > { %s319_s25 = scalar_lea.sflag (!%p3677_p0), [#allocation3], %s2754_s19  ;;  %s2760_s22 = scalar_lea.vmem (!%p3677_p0), [#allocation2], %s1846_s24 }
  0x6b   : > { %2493 = dma.done.wait (%p3678_p5), %s319_s25, 2048  }
  0x6c   : > { %2495 = vsyncadd (%p3678_p5), %s319_s25, 4294965248  ;;  %p3679_p10 = scmp.eq.s32.totalorder %s2603_s9, 0 }
  0x6e   : > { %2497 = dma.done.wait (%p3679_p10), [#allocation6], 10240   ;;  %p3680_p11 = pmov %p3679_p10 }
  0x6f   : > { %v2531_v0 = vmov 0.0   ;;  %v402_v1 = vld [vmem:[#allocation5 + $0x10] sm:$0xff]  ;;  %v405_v2 = vld [vmem:[#allocation5 + $0x28] sm:$0xff]  ;;  %v408_v3 = vld [vmem:[#allocation5 + $0x40] sm:$0xff]  ;;  %s3667_s10 = scalar_lea.vmem [#allocation11], %s2754_s19  ;;  %s3177_s17 = sshll.u32 %s2603_s9, 4 }
  0x70   : > { %2499 = vsyncadd (%p3680_p11), [#allocation6], 4294957056  ;;  %529 = vmatprep.mubr.f32.mxu0 %v2531_v0  ;;  %v2078_v4 = vpack.c.bf16 %v405_v2, %v402_v1  ;;  %v411_v5 = vld [vmem:[#allocation5 + $0x58] sm:$0xff]  ;;  %v414_v7 = vld [vmem:[#allocation5 + $0x70] sm:$0xff]  ;;  %p379_p1 = scmp.lt.s32.totalorder %s3177_s17, 63  ;;  %vm1593_vm0 = vcmask 7168  }
  0x71   : > { %v2082_v6 = vpack.c.bf16 %v411_v5, %v408_v3  ;;  %v417_v8 = vld [vmem:[#allocation5 + $0x88] sm:$0xff]  ;;  %v2772_v10 = vld [vmem:[%s2760_s22] sm:$0xff]  ;;  %v423_v12 = vld [vmem:[#allocation5 + $0xb8] sm:$0xff]  ;;  %s3208_s11 = scalar_lea.vmem [#allocation8], %s1846_s24  ;;  %s1877_s24 = sshll.u32 %s2603_s9, 11 }
  0x72   : > { %2079 = vmatprep.subr.bf16.mxu1 %v2078_v4  ;;  %v2086_v9 = vpack.c.bf16 %v417_v8, %v414_v7  ;;  %v420_v11 = vld [vmem:[#allocation5 + $0xa0] sm:$0xff]  ;;  %2022 = vmatprep.mubr.f32.mxu1 %v2772_v10  ;;  %v426_v14 = vld [vmem:[#allocation5 + $0xd0] sm:$0xff]  ;;  %v429_v15 = vld [vmem:[#allocation5 + $0xe8] sm:$0xff]  ;;  %s380_s21 = scalar_select %p379_p1, %s3177_s17, 63 }
  0x73   : > { %2081 = vmatpush3.bf16.msra.mxu1 %v2078_v4  ;;  %v2090_v13 = vpack.c.bf16 %v423_v12, %v420_v11  ;;  %v401_v16 = vld [vmem:[#allocation5 + $0x8] sm:$0xff]  ;;  %v404_v17 = vld [vmem:[#allocation5 + $0x20] sm:$0xff]  ;;  %v403_v19 = vld [vmem:[#allocation5 + $0x18] sm:$0xff]  ;;  %v2094_v25 = vpack.c.bf16 %v429_v15, %v426_v14  ;;  %s1637_s13 = sshll.u32 %s3208_s11, 4  ;;  %s3491_s15 = scalar_lea.hbm %s3657_s5, %s1877_s24  ;;  %s3493_s13 = int_to_ptr.vmem [resolvable:$true] %s1637_s13 }
  0x74   : > { %2083 = vmatprep.subr.bf16.mxu1 %v2082_v6  ;;  %v400_v18 = vld [vmem:[#allocation5] sm:$0xff]  ;;  %v2046_v20 = vpack.c.bf16 %v404_v17, %v401_v16  ;;  %v407_v22 = vld [vmem:[#allocation5 + $0x38] sm:$0xff]  ;;  %v410_v23 = vld [vmem:[#allocation5 + $0x50] sm:$0xff]  ;;  %s1851_s14 = sshll.u32 %s380_s21, 3  ;;  %s2392_s26 = scalar_lea.vmem %s3493_s13, 2048 }
  0x75   : > { %v2048_v21 = vpack.c.bf16 %v403_v19, %v400_v18  ;;  %v406_v24 = vld [vmem:[#allocation5 + $0x30] sm:$0xff]  ;;  %v2050_v26 = vpack.c.bf16 %v410_v23, %v407_v22  ;;  %v409_v27 = vld [vmem:[#allocation5 + $0x48] sm:$0xff]  ;;  %v416_v29 = vld [vmem:[#allocation5 + $0x80] sm:$0xff]  ;;  %p2393_p2 = scmp.ne.s32.totalorder %s3493_s13, %s2392_s26  ;;  %s2532_s25 = smov [#allocation8]  }
  0x76   : > { %v413_v28 = vld [vmem:[#allocation5 + $0x68] sm:$0xff]  ;;  %v432_v30 = vld [vmem:[#allocation5 + $0x100] sm:$0xff]  ;;  %v435_v31 = vld [vmem:[#allocation5 + $0x118] sm:$0xff]  ;;  %2047 = vmatprep.subr.bf16.mxu0 %v2046_v20  ;;  %v2052_v32 = vpack.c.bf16 %v409_v27, %v406_v24 }
  0x77   : > { %2085 = vmatpush3.bf16.msra.mxu1 %v2082_v6  ;;  %2049 = vmatpush1.bf16.msra.mxu0 %v2048_v21  ;;  %v2054_v33 = vpack.c.bf16 %v416_v29, %v413_v28  ;;  %v412_v34 = vld [vmem:[#allocation5 + $0x60] sm:$0xff]  ;;  %v415_v35 = vld [vmem:[#allocation5 + $0x78] sm:$0xff]  ;;  %v2098_v36 = vpack.c.bf16 %v435_v31, %v432_v30  ;;  %v422_v38 = vld [vmem:[#allocation5 + $0xb0] sm:$0xff]  ;;  %p2394_p4 = pnand %p2393_p2, %p2702_p6 }
  0x78   : > { %2087 = vmatprep.subr.bf16.mxu1 %v2086_v9  ;;  %2051 = vmatprep.subr.bf16.mxu0 %v2050_v26  ;;  %v419_v37 = vld [vmem:[#allocation5 + $0x98] sm:$0xff]  ;;  %v438_v39 = vld [vmem:[#allocation5 + $0x130] sm:$0xff]  ;;  %v441_v40 = vld [vmem:[#allocation5 + $0x148] sm:$0xff]  ;;  %v2056_v41 = vpack.c.bf16 %v415_v35, %v412_v34  ;;  %v450_v26 = vlaneseq }
  0x79   : > { %v2058_v42 = vpack.c.bf16 %v422_v38, %v419_v37  ;;  %v418_v43 = vld [vmem:[#allocation5 + $0x90] sm:$0xff]  ;;  %v421_v44 = vld [vmem:[#allocation5 + $0xa8] sm:$0xff]  ;;  %v2102_v45 = vpack.c.bf16 %v441_v40, %v438_v39  ;;  %v428_v47 = vld [vmem:[#allocation5 + $0xe0] sm:$0xff]  ;;  %p2395_p8 = pneg %p2394_p4 }
  0x7a   : > { %v425_v46 = vld [vmem:[#allocation5 + $0xc8] sm:$0xff]  ;;  %v444_v48 = vld [vmem:[#allocation5 + $0x160] sm:$0xff]  ;;  %v447_v49 = vld [vmem:[#allocation5 + $0x178] sm:$0xff]  ;;  %v2060_v50 = vpack.c.bf16 %v421_v44, %v418_v43  ;;  %v2807_v27 = vshrl.u32 %v450_v26, 7 }
  0x7b   : > { %2089 = vmatpush3.bf16.msra.mxu1 %v2086_v9  ;;  %2053 = vmatpush1.bf16.msra.mxu0 %v2052_v32  ;;  %v2062_v51 = vpack.c.bf16 %v428_v47, %v425_v46  ;;  %v424_v52 = vld [vmem:[#allocation5 + $0xc0] sm:$0xff]  ;;  %v427_v53 = vld [vmem:[#allocation5 + $0xd8] sm:$0xff]  ;;  %v2106_v54 = vpack.c.bf16 %v447_v49, %v444_v48  ;;  %v434_v56 = vld [vmem:[#allocation5 + $0x110] sm:$0xff] }
  0x7c   : > { %2091 = vmatprep.subr.bf16.mxu1 %v2090_v13  ;;  %2055 = vmatprep.subr.bf16.mxu0 %v2054_v33  ;;  %v431_v55 = vld [vmem:[#allocation5 + $0xf8] sm:$0xff]  ;;  %v2064_v57 = vpack.c.bf16 %v427_v53, %v424_v52  ;;  %v430_v59 = vld [vmem:[#allocation5 + $0xf0] sm:$0xff]  ;;  %v433_v60 = vld [vmem:[#allocation5 + $0x108] sm:$0xff]  ;;  %v460_v28 = vsub.s32 2, %v2807_v27 }
  0x7d   : > { %v2066_v58 = vpack.c.bf16 %v434_v56, %v431_v55  ;;  %v437_v61 = vld [vmem:[#allocation5 + $0x128] sm:$0xff]  ;;  %v440_v62 = vld [vmem:[#allocation5 + $0x140] sm:$0xff]  ;;  %v2068_v63 = vpack.c.bf16 %v433_v60, %v430_v59  ;;  %v439_v4 = vld [vmem:[#allocation5 + $0x138] sm:$0xff] }
  0x7e   : > { %v385_v1 = vld [vmem:[%s2760_s22 + $0x8] sm:$0xff]  ;;  %v2070_v2 = vpack.c.bf16 %v440_v62, %v437_v61  ;;  %v436_v3 = vld [vmem:[#allocation5 + $0x120] sm:$0xff]  ;;  %v386_v5 = vld [vmem:[%s2760_s22 + $0x10] sm:$0xff] }
  0x7f   : > { %2093 = vmatpush3.bf16.msra.mxu1 %v2090_v13  ;;  %2057 = vmatpush1.bf16.msra.mxu0 %v2056_v41  ;;  %v443_v6 = vld [vmem:[#allocation5 + $0x158] sm:$0xff]  ;;  %v446_v7 = vld [vmem:[#allocation5 + $0x170] sm:$0xff]  ;;  %v2072_v8 = vpack.c.bf16 %v439_v4, %v436_v3  ;;  %v445_v13 = vld [vmem:[#allocation5 + $0x168] sm:$0xff]  ;;  %v456_v4 = vsub.s32 1, %v2807_v27 }
  0x80   : > { %2095 = vmatprep.subr.bf16.mxu1 %v2094_v25  ;;  %2059 = vmatprep.subr.bf16.mxu0 %v2058_v42  ;;  %v387_v9 = vld [vmem:[%s2760_s22 + $0x18] sm:$0xff]  ;;  %v2074_v11 = vpack.c.bf16 %v446_v7, %v443_v6  ;;  %v442_v12 = vld [vmem:[#allocation5 + $0x150] sm:$0xff]  ;;  %v388_v14 = vld [vmem:[%s2760_s22 + $0x20] sm:$0xff] }
  0x81   : > { %v2076_v15 = vpack.c.bf16 %v445_v13, %v442_v12  ;;  %v389_v16 = vld [vmem:[%s2760_s22 + $0x28] sm:$0xff]  ;;  %v390_v17 = vld [vmem:[%s2760_s22 + $0x30] sm:$0xff]  ;;  %v391_v18 = vld [vmem:[%s2760_s22 + $0x38] sm:$0xff] }
  0x82   : > { %v392_v19 = vld [vmem:[%s2760_s22 + $0x40] sm:$0xff]  ;;  %v393_v20 = vld [vmem:[%s2760_s22 + $0x48] sm:$0xff]  ;;  %v394_v21 = vld [vmem:[%s2760_s22 + $0x50] sm:$0xff] }
  0x83   : > { %2097 = vmatpush3.bf16.msra.mxu1 %v2094_v25  ;;  %2061 = vmatpush1.bf16.msra.mxu0 %v2060_v50  ;;  %v395_v22 = vld [vmem:[%s2760_s22 + $0x58] sm:$0xff]  ;;  %v396_v23 = vld [vmem:[%s2760_s22 + $0x60] sm:$0xff]  ;;  %v398_v24 = vld [vmem:[%s2760_s22 + $0x70] sm:$0xff] }
  0x84   : > { %2099 = vmatprep.subr.bf16.mxu1 %v2098_v36  ;;  %2063 = vmatprep.subr.bf16.mxu0 %v2062_v51  ;;  %v399_v25 = vld [vmem:[%s2760_s22 + $0x78] sm:$0xff]  ;;  %v2813_v29 = vld [vmem:[%s3654_s2] sm:$0x7]  ;;  %v1378_v6 = vld [vmem:[#allocation7 + $0x8] sm:$0xff] }
  0x85   : > { %v461_v30 = vrot.slane %v2813_v29, %v460_v28  ;;  %v1395_v7 = vld [vmem:[#allocation7 + $0x90] sm:$0xff] }
  0x86   : > { %v1379_v13 = vld [vmem:[#allocation7 + $0x10] sm:$0xff] }
  0x87   : > { %2101 = vmatpush3.bf16.msra.mxu1 %v2098_v36  ;;  %2065 = vmatpush1.bf16.msra.mxu0 %v2064_v57  ;;  %v1399_v28 = vld [vmem:[#allocation7 + $0xb0] sm:$0xff] }
  0x88   : > { %2103 = vmatprep.subr.bf16.mxu1 %v2102_v45  ;;  %2067 = vmatprep.subr.bf16.mxu0 %v2066_v58 }
  0x8b   : > { %2105 = vmatpush3.bf16.msra.mxu1 %v2102_v45  ;;  %2069 = vmatpush1.bf16.msra.mxu0 %v2068_v63  ;;  %v1393_v63 = vld [vmem:[#allocation7 + $0x80] sm:$0xff] }
  0x8c   : > { %2107 = vmatprep.subr.bf16.mxu1 %v2106_v54  ;;  %2071 = vmatprep.subr.bf16.mxu0 %v2070_v2  ;;  %v1377_v2 = vld [vmem:[#allocation7] sm:$0xff] }
  0x8f   : > { %2109 = vmatpush3.bf16.msra.mxu1 %v2106_v54  ;;  %2073 = vmatpush1.bf16.msra.mxu0 %v2072_v8  ;;  %v1396_v8 = vld [vmem:[#allocation7 + $0x98] sm:$0xff] }
  0x90   : > { %2075 = vmatprep.subr.bf16.mxu0 %v2074_v11  ;;  %v2112_v11 = vpack.c.bf16 %v1378_v6, %v1377_v2  ;;  %v2114_v12 = vpack.c.bf16 %v1396_v8, %v1395_v7  ;;  %v1385_v2 = vld [vmem:[#allocation7 + $0x40] sm:$0xff]  ;;  %v1403_v6 = vld [vmem:[#allocation7 + $0xd0] sm:$0xff]  ;;  %v1404_v7 = vld [vmem:[#allocation7 + $0xd8] sm:$0xff] }
  0x92   : > { %2023 = vmatmul.mubr.f32.vlgmr.msra.gmra.mrb[0].mxu1 %v385_v1 }
  0x93   : > { %2025 = vmatprep.mubr.f32.mxu1 %v386_v5  ;;  %2077 = vmatpush1.bf16.msra.mxu0 %v2076_v15  ;;  %v1397_v15 = vld [vmem:[#allocation7 + $0xa0] sm:$0xff] }
  0x96   : > { %2026 = vmatmul.mubr.f32.gmra.mrb[2].mxu1 %v387_v9  ;;  %530 = vmatmul.mubr.f32.vlgmr.msra.gmra.mrb[0].mxu0 %v2772_v10  ;;  %v397_v10 = vld [vmem:[%s2760_s22 + $0x68] sm:$0xff]  ;;  %s3194_s22 = scalar_lea.vmem %s3658_s6, %s1851_s14  ;;  %s1611_s14 = scalar_lea.sflag [#allocation4], %s2754_s19 }
  0x97   : > { %2028 = vmatprep.mubr.f32.mxu1 %v388_v14  ;;  %535 = vmatprep.mubr.f32.mxu0 %v2531_v0 }
  0x9a   : > { %2029 = vmatmul.mubr.f32.gmra.mrb[4].mxu1 %v389_v16  ;;  %536 = vmatmul.mubr.f32.gmra.mrb[2].mxu0 %v385_v1  ;;  %v1394_v1 = vld [vmem:[#allocation7 + $0x88] sm:$0xff] }
  0x9b   : > { %2031 = vmatprep.mubr.f32.mxu1 %v390_v17  ;;  %541 = vmatprep.mubr.f32.mxu0 %v2531_v0 }
  0x9e   : > { %2032 = vmatmul.mubr.f32.gmra.mrb[6].mxu1 %v391_v18  ;;  %542 = vmatmul.mubr.f32.gmra.mrb[4].mxu0 %v386_v5  ;;  %v2110_v5 = vpack.c.bf16 %v1394_v1, %v1393_v63 }
  0x9f   : > { %2034 = vmatprep.mubr.f32.mxu1 %v392_v19  ;;  %547 = vmatprep.mubr.f32.mxu0 %v2531_v0 }
  0xa0   : > { %2142 = vmatprep.subr.bf16.mxu1 %v2110_v5  ;;  %2111 = vmatprep.subr.bf16.mxu0 %v2110_v5 }
  0xa1   : > { %2150 = vmatpush3.bf16.msra.mxu1 %v2112_v11  ;;  %2113 = vmatpush3.bf16.msra.mxu0 %v2112_v11 }
  0xa2   : > { %2035 = vmatmul.mubr.f32.gmra.mrb[8].mxu1 %v393_v20  ;;  %548 = vmatmul.mubr.f32.gmra.mrb[6].mxu0 %v387_v9 }
  0xa3   : > { %2037 = vmatprep.mubr.f32.mxu1 %v394_v21  ;;  %553 = vmatprep.mubr.f32.mxu0 %v2531_v0 }
  0xa4   : > { %2143 = vmatprep.subr.bf16.mxu1 %v2114_v12  ;;  %2115 = vmatprep.subr.bf16.mxu0 %v2114_v12 }
  0xa6   : > { %2038 = vmatmul.mubr.f32.gmra.mrb[10].mxu1 %v395_v22  ;;  %554 = vmatmul.mubr.f32.gmra.mrb[8].mxu0 %v388_v14  ;;  %v1380_v14 = vld [vmem:[#allocation7 + $0x18] sm:$0xff] }
  0xa7   : > { %2040 = vmatprep.mubr.f32.mxu1 %v396_v23  ;;  %559 = vmatprep.mubr.f32.mxu0 %v2531_v0 }
  0xaa   : > { %2041 = vmatmul.mubr.f32.gmra.mrb[12].mxu1 %v397_v10  ;;  %560 = vmatmul.mubr.f32.gmra.mrb[10].mxu0 %v389_v16 }
  0xab   : > { %2043 = vmatprep.mubr.f32.mxu1 %v398_v24  ;;  %565 = vmatprep.mubr.f32.mxu0 %v2531_v0 }
  0xae   : > { %2044 = vmatmul.mubr.f32.gmra.mrb[14].mxu1 %v399_v25  ;;  %566 = vmatmul.mubr.f32.gmra.mrb[12].mxu0 %v390_v17  ;;  %v1398_v17 = vld [vmem:[#allocation7 + $0xa8] sm:$0xff] }
  0xaf   : > { %571 = vmatprep.mubr.f32.mxu0 %v2531_v0 }
  0xb2   : > { %572 = vmatmul.mubr.f32.gmra.mrb[14].mxu0 %v391_v18  ;;  %v2870_v18 = vrot.slane %v2813_v29, %v456_v4  ;;  %v1386_v4 = vld [vmem:[#allocation7 + $0x48] sm:$0xff] }
  0xb3   : > { %577 = vmatprep.mubr.f32.mxu0 %v2531_v0  ;;  %v2128_v11 = vpack.c.bf16 %v1386_v4, %v1385_v2  ;;  %v1392_v2 = vld [vmem:[#allocation7 + $0x78] sm:$0xff] }
  0xb6   : > { %578 = vmatmul.mubr.f32.gmra.mrb[16].mxu0 %v392_v19 }
  0xb7   : > { %583 = vmatprep.mubr.f32.mxu0 %v2531_v0 }
  0xba   : > { %584 = vmatmul.mubr.f32.gmra.mrb[18].mxu0 %v393_v20  ;;  %v2116_v20 = vpack.c.bf16 %v1380_v14, %v1379_v13  ;;  %v2130_v13 = vpack.c.bf16 %v1404_v7, %v1403_v6  ;;  %v1387_v14 = vld [vmem:[#allocation7 + $0x50] sm:$0xff] }
  0xbb   : > { %589 = vmatprep.mubr.f32.mxu0 %v2531_v0 }
  0xbc   : > { %2151 = vmatpush3.bf16.msra.mxu1 %v2116_v20  ;;  %2117 = vmatpush3.bf16.msra.mxu0 %v2116_v20  ;;  %v1405_v20 = vld [vmem:[#allocation7 + $0xe0] sm:$0xff] }
  0xbe   : > { %590 = vmatmul.mubr.f32.gmra.mrb[20].mxu0 %v394_v21 }
  0xbf   : > { %595 = vmatprep.mubr.f32.mxu0 %v2531_v0 }
  0xc2   : > { %596 = vmatmul.mubr.f32.gmra.mrb[22].mxu0 %v395_v22  ;;  %v2118_v22 = vpack.c.bf16 %v1398_v17, %v1397_v15  ;;  %v1388_v15 = vld [vmem:[#allocation7 + $0x58] sm:$0xff] }
  0xc3   : > { %601 = vmatprep.mubr.f32.mxu0 %v2531_v0 }
  0xc4   : > { %2144 = vmatprep.subr.bf16.mxu1 %v2118_v22  ;;  %2119 = vmatprep.subr.bf16.mxu0 %v2118_v22  ;;  %v1406_v22 = vld [vmem:[#allocation7 + $0xe8] sm:$0xff] }
  0xc6   : > { %602 = vmatmul.mubr.f32.gmra.mrb[24].mxu0 %v396_v23  ;;  %v1381_v23 = vld [vmem:[#allocation7 + $0x20] sm:$0xff] }
  0xc7   : > { %607 = vmatprep.mubr.f32.mxu0 %v2531_v0 }
  0xca   : > { %608 = vmatmul.mubr.f32.gmra.mrb[26].mxu0 %v397_v10  ;;  %v1382_v10 = vld [vmem:[#allocation7 + $0x28] sm:$0xff] }
  0xcb   : > { %613 = vmatprep.mubr.f32.mxu0 %v2531_v0 }
  0xce   : > { %614 = vmatmul.mubr.f32.gmra.mrb[28].mxu0 %v398_v24 }
  0xcf   : > { %619 = vmatprep.mubr.f32.mxu0 %v2531_v0 }
  0xd2   : > { %620 = vmatmul.mubr.f32.gmra.mrb[30].mxu0 %v399_v25 }
 0x165   : > { %v2024_v31 = vpop.f32.mrb[0].mxu1 }
 0x166   : > { %v692_v32 = vpop.f32.mrb[1].mxu1  ;;  %v2819_v36 = vadd.f32 %v2024_v31, %v461_v30 }
 0x167   : > { %v2816_v33 = vadd.f32 %v692_v32, %v461_v30 }
 0x169   : > { %v2027_v34 = vpop.f32.mrb[2].mxu1  ;;  %771 = vmax.xlane.f32.xlu0 %v2816_v33  ;;  %v2864_v3 = vpop.f32.mrb[0].mxu0 }
 0x16a   : > { %v702_v35 = vpop.f32.mrb[3].mxu1  ;;  %v2825_v40 = vadd.f32 %v2027_v34, %v461_v30  ;;  %v533_v9 = vpop.f32.mrb[1].mxu0 }
 0x16b   : > { %v2821_v37 = vadd.f32 %v702_v35, %v461_v30  ;;  %v534_v24 = vadd.f32 %v533_v9, %v2870_v18  ;;  %v2120_v35 = vpack.c.bf16 %v1382_v10, %v1381_v23  ;;  %v452_v10 = vsub.s32 0, %v2807_v27 }
 0x16d   : > { %v2030_v38 = vpop.f32.mrb[4].mxu1  ;;  %775 = vmax.xlane.f32.xlu1 %v2821_v37  ;;  %773 = vmax.xlane.f32.xlu0 %v2819_v36  ;;  %v2867_v16 = vpop.f32.mrb[2].mxu0  ;;  %v1346_v32 = vmax.f32 %v534_v24, 0.0  ;;  %v2914_v27 = vrot.slane %v2813_v29, %v452_v10 }
 0x16e   : > { %v712_v39 = vpop.f32.mrb[5].mxu1  ;;  %v2831_v44 = vadd.f32 %v2030_v38, %v461_v30  ;;  %v2872_v19 = vpop.f32.mrb[3].mxu0  ;;  %2152 = vmatpush3.bf16.msra.mxu1 %v2120_v35  ;;  %2121 = vmatpush3.bf16.msra.mxu0 %v2120_v35  ;;  %v1389_v35 = vld [vmem:[#allocation7 + $0x60] sm:$0xff] }
 0x16f   : > { %v2827_v41 = vadd.f32 %v712_v39, %v461_v30  ;;  %1480 = vmatprep.mubr.f32.mxu0 %v1346_v32  ;;  %v2134_v32 = vpack.c.bf16 %v1406_v22, %v1405_v20  ;;  %v532_v29 = vadd.f32 %v2864_v3, %v2914_v27  ;;  %v540_v7 = vadd.f32 %v2872_v19, %v2870_v18 }
 0x170   : > { %v538_v3 = vadd.f32 %v2867_v16, %v2914_v27 }
 0x171   : > { %v2033_v42 = vpop.f32.mrb[6].mxu1  ;;  %777 = vmax.xlane.f32.xlu1 %v2825_v40  ;;  %779 = vmax.xlane.f32.xlu0 %v2827_v41  ;;  %v2874_v21 = vpop.f32.mrb[4].mxu0  ;;  %v1348_v10 = vmax.f32 %v540_v7, 0.0 }
 0x172   : > { %v722_v43 = vpop.f32.mrb[7].mxu1  ;;  %v2837_v48 = vadd.f32 %v2033_v42, %v461_v30  ;;  %v2877_v25 = vpop.f32.mrb[5].mxu0  ;;  %v1383_v42 = vld [vmem:[#allocation7 + $0x30] sm:$0xff] }
 0x173   : > { %v2833_v45 = vadd.f32 %v722_v43, %v461_v30  ;;  %v1384_v43 = vld [vmem:[#allocation7 + $0x38] sm:$0xff] }
 0x175   : > { %v2036_v46 = vpop.f32.mrb[8].mxu1  ;;  %781 = vmax.xlane.f32.xlu1 %v2831_v44  ;;  %783 = vmax.xlane.f32.xlu0 %v2833_v45  ;;  %v2879_v31 = vpop.f32.mrb[6].mxu0 }
 0x176   : > { %v732_v47 = vpop.f32.mrb[9].mxu1  ;;  %v2843_v52 = vadd.f32 %v2036_v46, %v461_v30  ;;  %v2881_v34 = vpop.f32.mrb[7].mxu0 }
 0x177   : > { %v2839_v49 = vadd.f32 %v732_v47, %v461_v30  ;;  %v1401_v47 = vld [vmem:[#allocation7 + $0xc0] sm:$0xff] }
 0x179   : > { %v2039_v50 = vpop.f32.mrb[10].mxu1  ;;  %785 = vmax.xlane.f32.xlu1 %v2837_v48  ;;  %787 = vmax.xlane.f32.xlu0 %v2839_v49  ;;  %v2883_v38 = vpop.f32.mrb[8].mxu0 }
 0x17a   : > { %v742_v51 = vpop.f32.mrb[11].mxu1  ;;  %v2849_v56 = vadd.f32 %v2039_v50, %v461_v30  ;;  %v557_v46 = vpop.f32.mrb[9].mxu0  ;;  %v1402_v50 = vld [vmem:[#allocation7 + $0xc8] sm:$0xff] }
 0x17b   : > { %v2845_v53 = vadd.f32 %v742_v51, %v461_v30  ;;  %v558_v51 = vadd.f32 %v557_v46, %v2870_v18  ;;  %v2126_v1 = vpack.c.bf16 %v1402_v50, %v1401_v47  ;;  %v1408_v46 = vld [vmem:[#allocation7 + $0xf8] sm:$0xff] }
 0x17d   : > { %v2042_v54 = vpop.f32.mrb[12].mxu1  ;;  %789 = vmax.xlane.f32.xlu1 %v2843_v52  ;;  %791 = vmax.xlane.f32.xlu0 %v2845_v53 }
 0x17e   : > { %v752_v55 = vpop.f32.mrb[13].mxu1  ;;  %v2855_v60 = vadd.f32 %v2042_v54, %v461_v30  ;;  %v2886_v54 = vpop.f32.mrb[10].mxu0 }
 0x17f   : > { %v2851_v57 = vadd.f32 %v752_v55, %v461_v30  ;;  %v2888_v55 = vpop.f32.mrb[11].mxu0 }
 0x181   : > { %v2045_v58 = vpop.f32.mrb[14].mxu1  ;;  %793 = vmax.xlane.f32.xlu1 %v2849_v56  ;;  %795 = vmax.xlane.f32.xlu0 %v2851_v57  ;;  %v2890_v63 = vpop.f32.mrb[12].mxu0 }
 0x182   : > { %v762_v59 = vpop.f32.mrb[15].mxu1  ;;  %v2861_v62 = vadd.f32 %v2045_v58, %v461_v30  ;;  %v2124_v58 = vpack.c.bf16 %v1384_v43, %v1383_v42  ;;  %v2892_v5 = vpop.f32.mrb[13].mxu0  ;;  %v1407_v43 = vld [vmem:[#allocation7 + $0xf0] sm:$0xff] }
 0x183   : > { %v2857_v61 = vadd.f32 %v762_v59, %v461_v30  ;;  %v1400_v30 = vld [vmem:[#allocation7 + $0xb8] sm:$0xff]  ;;  %v1354_v59 = vmax.f32 %v558_v51, 0.0 }
 0x184   : > { %v2122_v39 = vpack.c.bf16 %v1400_v30, %v1399_v28  ;;  %v2132_v28 = vpack.c.bf16 %v1388_v15, %v1387_v14  ;;  %v564_v15 = vadd.f32 %v2888_v55, %v2870_v18  ;;  %v546_v55 = vadd.f32 %v2877_v25, %v2870_v18 }
 0x185   : > { %797 = vmax.xlane.f32.xlu1 %v2855_v60  ;;  %799 = vmax.xlane.f32.xlu0 %v2857_v61  ;;  %v2894_v8 = vpop.f32.mrb[14].mxu0 }
 0x186   : > { %2145 = vmatprep.subr.bf16.mxu1 %v2122_v39  ;;  %2123 = vmatprep.subr.bf16.mxu0 %v2122_v39  ;;  %v2896_v9 = vpop.f32.mrb[15].mxu0  ;;  %v1390_v39 = vld [vmem:[#allocation7 + $0x68] sm:$0xff]  ;;  %v1350_v25 = vmax.f32 %v546_v55, 0.0 }
 0x187   : > { %1500 = vmatprep.mubr.f32.mxu1 %v1354_v59  ;;  %2153 = vmatpush3.bf16.msra.mxu1 %v2124_v58  ;;  %v2136_v51 = vpack.c.bf16 %v1390_v39, %v1389_v35  ;;  %v2138_v59 = vpack.c.bf16 %v1408_v46, %v1407_v43  ;;  %v1356_v39 = vmax.f32 %v564_v15, 0.0  ;;  %v570_v43 = vadd.f32 %v2892_v5, %v2870_v18 }
 0x188   : > { %2125 = vmatpush3.bf16.msra.mxu0 %v2124_v58  ;;  %2146 = vmatprep.subr.bf16.mxu1 %v2126_v1  ;;  %v1347_v46 = vmax.f32 %v538_v3, 0.0  ;;  %v576_v5 = vadd.f32 %v2896_v9, %v2870_v18 }
 0x189   : > { %801 = vmax.xlane.f32.xlu1 %v2861_v62  ;;  %v2898_v12 = vpop.f32.mrb[16].mxu0  ;;  %2127 = vmatprep.subr.bf16.mxu0 %v2126_v1  ;;  %v1391_v1 = vld [vmem:[#allocation7 + $0x70] sm:$0xff] }
 0x18a   : > { %v2900_v17 = vpop.f32.mrb[17].mxu0  ;;  %v2140_v14 = vpack.c.bf16 %v1392_v2, %v1391_v1  ;;  %v552_v1 = vadd.f32 %v2881_v34, %v2870_v18  ;;  %v1358_v2 = vmax.f32 %v570_v43, 0.0  ;;  %v580_v3 = vadd.f32 %v2898_v12, %v2914_v27 }
 0x18b   : > { %2154 = vmatpush3.bf16.msra.mxu1 %v2128_v11  ;;  %v582_v34 = vadd.f32 %v2900_v17, %v2870_v18 }
 0x18c   : > { %2129 = vmatpush3.bf16.msra.mxu0 %v2128_v11  ;;  %2147 = vmatprep.subr.bf16.mxu1 %v2130_v13  ;;  %v556_v11 = vadd.f32 %v2883_v38, %v2914_v27  ;;  %v1345_v38 = vmax.f32 %v532_v29, 0.0 }
 0x18d   : > { %v2902_v23 = vpop.f32.mrb[18].mxu0  ;;  %2131 = vmatprep.subr.bf16.mxu0 %v2130_v13 }
 0x18e   : > { %v2905_v24 = vpop.f32.mrb[19].mxu0 }
 0x18f   : > { %2155 = vmatpush3.bf16.msra.mxu1 %v2132_v28 }
 0x190   : > { %2133 = vmatpush3.bf16.msra.mxu0 %v2132_v28  ;;  %2148 = vmatprep.subr.bf16.mxu1 %v2134_v32  ;;  %v1353_v28 = vmax.f32 %v556_v11, 0.0  ;;  %v1352_v11 = vmax.f32 %v552_v1, 0.0 }
 0x191   : > { %v2907_v30 = vpop.f32.mrb[20].mxu0  ;;  %2135 = vmatprep.subr.bf16.mxu0 %v2134_v32  ;;  %v562_v32 = vadd.f32 %v2886_v54, %v2914_v27  ;;  %v568_v54 = vadd.f32 %v2890_v63, %v2914_v27  ;;  %v574_v63 = vadd.f32 %v2894_v8, %v2914_v27  ;;  %v588_v8 = vadd.f32 %v2905_v24, %v2870_v18 }
 0x192   : > { %v2909_v42 = vpop.f32.mrb[21].mxu0  ;;  %v592_v12 = vadd.f32 %v2907_v30, %v2914_v27 }
 0x193   : > { %2156 = vmatpush3.bf16.msra.mxu1 %v2136_v51  ;;  %v1357_v7 = vmax.f32 %v568_v54, 0.0  ;;  %v1359_v9 = vmax.f32 %v574_v63, 0.0  ;;  %v1364_v17 = vmax.f32 %v588_v8, 0.0 }
 0x194   : > { %2137 = vmatpush3.bf16.msra.mxu0 %v2136_v51  ;;  %2149 = vmatprep.subr.bf16.mxu1 %v2138_v59  ;;  %v544_v51 = vadd.f32 %v2874_v21, %v2914_v27  ;;  %v550_v21 = vadd.f32 %v2879_v31, %v2914_v27  ;;  %v1362_v31 = vmax.f32 %v582_v34, 0.0  ;;  %v1365_v55 = vmax.f32 %v592_v12, 0.0 }
 0x195   : > { %v2911_v47 = vpop.f32.mrb[22].mxu0  ;;  %2139 = vmatprep.subr.bf16.mxu0 %v2138_v59  ;;  %v1355_v59 = vmax.f32 %v562_v32, 0.0 }
 0x196   : > { %v2916_v50 = vpop.f32.mrb[23].mxu0  ;;  %v1349_v29 = vmax.f32 %v544_v51, 0.0  ;;  %v1351_v15 = vmax.f32 %v550_v21, 0.0 }
 0x197   : > { %2157 = vmatpush3.bf16.msra.mxu1 %v2140_v14  ;;  %v600_v24 = vadd.f32 %v2916_v50, %v2870_v18 }
 0x198   : > { %2141 = vmatpush3.bf16.msra.mxu0 %v2140_v14  ;;  %v1360_v14 = vmax.f32 %v576_v5, 0.0 }
 0x199   : > { %v2918_v58 = vpop.f32.mrb[24].mxu0 }
 0x19a   : > { %v2920_v4 = vpop.f32.mrb[25].mxu0  ;;  %1501 = vmatmul.mubr.f32.vlgmr.msra.gmra.mrb[16].mxu1 %v1353_v28  ;;  %v594_v28 = vadd.f32 %v2909_v42, %v2870_v18  ;;  %v604_v30 = vadd.f32 %v2918_v58, %v2914_v27 }
 0x19b   : > { %1481 = vmatmul.mubr.f32.vlgmr.msra.gmra.mrb[32].mxu0 %v1345_v38  ;;  %1505 = vmatprep.mubr.f32.mxu1 %v1356_v39  ;;  %v1361_v38 = vmax.f32 %v580_v3, 0.0  ;;  %v1368_v39 = vmax.f32 %v600_v24, 0.0  ;;  %v606_v42 = vadd.f32 %v2920_v4, %v2870_v18 }
 0x19c   : > { %1485 = vmatprep.mubr.f32.mxu0 %v1348_v10  ;;  %v586_v10 = vadd.f32 %v2902_v23, %v2914_v27  ;;  %v598_v23 = vadd.f32 %v2911_v47, %v2914_v27  ;;  %v1369_v51 = vmax.f32 %v604_v30, 0.0 }
 0x19d   : > { %v2922_v6 = vpop.f32.mrb[26].mxu0 }
 0x19e   : > { %v2930_v13 = vpop.f32.mrb[27].mxu0  ;;  %1506 = vmatmul.mubr.f32.gmra.mrb[18].mxu1 %v1355_v59  ;;  %v1363_v32 = vmax.f32 %v586_v10, 0.0  ;;  %v1367_v43 = vmax.f32 %v598_v23, 0.0  ;;  %v610_v47 = vadd.f32 %v2922_v6, %v2914_v27 }
 0x19f   : > { %1486 = vmatmul.mubr.f32.gmra.mrb[34].mxu0 %v1347_v46  ;;  %1510 = vmatprep.mubr.f32.mxu1 %v1358_v2  ;;  %v1370_v46 = vmax.f32 %v606_v42, 0.0  ;;  %v612_v50 = vadd.f32 %v2930_v13, %v2870_v18 }
 0x1a0   : > { %1490 = vmatprep.mubr.f32.mxu0 %v1350_v25  ;;  %v1371_v54 = vmax.f32 %v610_v47, 0.0 }
 0x1a1   : > { %v2934_v20 = vpop.f32.mrb[28].mxu0  ;;  %v1372_v59 = vmax.f32 %v612_v50, 0.0 }
 0x1a2   : > { %v2936_v22 = vpop.f32.mrb[29].mxu0  ;;  %1511 = vmatmul.mubr.f32.gmra.mrb[20].mxu1 %v1357_v7  ;;  %v616_v58 = vadd.f32 %v2934_v20, %v2914_v27 }
 0x1a3   : > { %1491 = vmatmul.mubr.f32.gmra.mrb[36].mxu0 %v1349_v29  ;;  %1515 = vmatprep.mubr.f32.mxu1 %v1360_v14  ;;  %v618_v4 = vadd.f32 %v2936_v22, %v2870_v18 }
 0x1a4   : > { %1495 = vmatprep.mubr.f32.mxu0 %v1352_v11  ;;  %v1373_v1 = vmax.f32 %v616_v58, 0.0 }
 0x1a5   : > { %v2940_v19 = vpop.f32.mrb[30].mxu0  ;;  %v1374_v25 = vmax.f32 %v618_v4, 0.0 }
 0x1a6   : > { %v623_v35 = vpop.f32.mrb[31].mxu0  ;;  %1516 = vmatmul.mubr.f32.gmra.mrb[22].mxu1 %v1359_v9  ;;  %v622_v13 = vadd.f32 %v2940_v19, %v2914_v27 }
 0x1a7   : > { %v2949_v16 = vadd.f32 %v623_v35, %v2870_v18  ;;  %1496 = vmatmul.mubr.f32.gmra.mrb[38].mxu0 %v1351_v15  ;;  %1520 = vmatprep.mubr.f32.mxu1 %v1362_v31  ;;  %v1366_v35 = vmax.f32 %v594_v28, 0.0 }
 0x1a8   : > { %v1375_v6 = vmax.f32 %v622_v13, 0.0 }
 0x1a9   : > { %v1376_v2 = vmax.f32 %v2949_v16, 0.0 }
 0x1aa   : > { %1521 = vmatmul.mubr.f32.gmra.mrb[24].mxu1 %v1361_v38 }
 0x1ab   : > { %1525 = vmatprep.mubr.f32.mxu1 %v1364_v17 }
 0x1ae   : > { %1526 = vmatmul.mubr.f32.gmra.mrb[26].mxu1 %v1363_v32 }
 0x1af   : > { %1530 = vmatprep.mubr.f32.mxu1 %v1366_v35 }
 0x1b2   : > { %1531 = vmatmul.mubr.f32.gmra.mrb[28].mxu1 %v1365_v55 }
 0x1b3   : > { %1535 = vmatprep.mubr.f32.mxu1 %v1368_v39 }
 0x1b6   : > { %1536 = vmatmul.mubr.f32.gmra.mrb[30].mxu1 %v1367_v43 }
 0x1b7   : > { %1540 = vmatprep.mubr.f32.mxu1 %v1370_v46 }
 0x1ba   : > { %1541 = vmatmul.mubr.f32.gmra.mrb[32].mxu1 %v1369_v51 }
 0x1bb   : > { %1545 = vmatprep.mubr.f32.mxu1 %v1372_v59 }
 0x1be   : > { %1546 = vmatmul.mubr.f32.gmra.mrb[34].mxu1 %v1371_v54 }
 0x1bf   : > { %1550 = vmatprep.mubr.f32.mxu1 %v1374_v25 }
 0x1c2   : > { %1551 = vmatmul.mubr.f32.gmra.mrb[36].mxu1 %v1373_v1 }
 0x1c3   : > { %1555 = vmatprep.mubr.f32.mxu1 %v1376_v2 }
 0x1c6   : > { %1556 = vmatmul.mubr.f32.gmra.mrb[38].mxu1 %v1375_v6 }
 0x1f6   : > { %v772_v5 = vpop.xlane.xlu0 %771 }
 0x1f7   : > { %v803_v18 = vsub.f32 %v2816_v33, %v772_v5 }
 0x1f9   : > { %v819_v22 = vmul.f32 1.442695, %v803_v18 }
 0x1fa   : > { %v776_v29 = vpop.xlane.xlu1 %775  ;;  %v774_v20 = vpop.xlane.xlu0 %773 }
 0x1fb   : > { %2242 = vpow2.f32 %v819_v22  ;;  %v805_v21 = vsub.f32 %v2821_v37, %v776_v29  ;;  %v804_v7 = vsub.f32 %v2819_v36, %v774_v20 }
 0x1fd   : > { %v823_v63 = vmul.f32 1.442695, %v805_v21  ;;  %v821_v27 = vmul.f32 1.442695, %v804_v7 }
 0x1fe   : > { %v778_v19 = vpop.xlane.xlu1 %777  ;;  %v780_v16 = vpop.xlane.xlu0 %779 }
 0x1ff   : > { %2244 = vpow2.f32 %v823_v63  ;;  %v806_v11 = vsub.f32 %v2825_v40, %v778_v19  ;;  %v807_v14 = vsub.f32 %v2827_v41, %v780_v16 }
 0x200   : > { %2246 = vpow2.f32 %v821_v27 }
 0x201   : > { %v825_v34 = vmul.f32 1.442695, %v806_v11  ;;  %v827_v33 = vmul.f32 1.442695, %v807_v14 }
 0x202   : > { %v782_v15 = vpop.xlane.xlu1 %781  ;;  %v784_v9 = vpop.xlane.xlu0 %783 }
 0x203   : > { %2248 = vpow2.f32 %v825_v34  ;;  %v808_v3 = vsub.f32 %v2831_v44, %v782_v15  ;;  %v809_v37 = vsub.f32 %v2833_v45, %v784_v9 }
 0x204   : > { %2250 = vpow2.f32 %v827_v33 }
 0x205   : > { %v3001_v36 = vpop.eup %2242  ;;  %v829_v31 = vmul.f32 1.442695, %v808_v3  ;;  %v831_v8 = vmul.f32 1.442695, %v809_v37 }
 0x206   : > { %v786_v38 = vpop.xlane.xlu1 %785  ;;  %851 = vadd.xlane.f32.xlu0 %v3001_v36  ;;  %v788_v40 = vpop.xlane.xlu0 %787 }
 0x207   : > { %2252 = vpow2.f32 %v829_v31  ;;  %v810_v41 = vsub.f32 %v2837_v48, %v786_v38  ;;  %v811_v10 = vsub.f32 %v2839_v49, %v788_v40 }
 0x208   : > { %2254 = vpow2.f32 %v831_v8 }
 0x209   : > { %v3006_v17 = vpop.eup %2244  ;;  %v833_v44 = vmul.f32 1.442695, %v810_v41  ;;  %v835_v28 = vmul.f32 1.442695, %v811_v10 }
 0x20a   : > { %v3008_v45 = vpop.eup %2246  ;;  %v790_v32 = vpop.xlane.xlu1 %789  ;;  %855 = vadd.xlane.f32.xlu0 %v3006_v17 }
 0x20b   : > { %v792_v12 = vpop.xlane.xlu0 %791  ;;  %2256 = vpow2.f32 %v833_v44  ;;  %v812_v35 = vsub.f32 %v2843_v52, %v790_v32  ;;  %853 = vadd.xlane.f32.xlu1 %v3008_v45 }
 0x20c   : > { %v813_v48 = vsub.f32 %v2845_v53, %v792_v12  ;;  %2258 = vpow2.f32 %v835_v28 }
 0x20d   : > { %v3014_v49 = vpop.eup %2248  ;;  %v837_v24 = vmul.f32 1.442695, %v812_v35 }
 0x20e   : > { %v839_v55 = vmul.f32 1.442695, %v813_v48  ;;  %v3016_v23 = vpop.eup %2250  ;;  %v794_v39 = vpop.xlane.xlu1 %793 }
 0x20f   : > { %v796_v42 = vpop.xlane.xlu0 %795  ;;  %2260 = vpow2.f32 %v837_v24  ;;  %v814_v43 = vsub.f32 %v2849_v56, %v794_v39  ;;  %857 = vadd.xlane.f32.xlu1 %v3014_v49  ;;  %859 = vadd.xlane.f32.xlu0 %v3016_v23 }
 0x210   : > { %v815_v52 = vsub.f32 %v2851_v57, %v796_v42  ;;  %2262 = vpow2.f32 %v839_v55 }
 0x211   : > { %v3022_v53 = vpop.eup %2252  ;;  %v841_v30 = vmul.f32 1.442695, %v814_v43 }
 0x212   : > { %v843_v46 = vmul.f32 1.442695, %v815_v52  ;;  %v3024_v50 = vpop.eup %2254  ;;  %v798_v51 = vpop.xlane.xlu1 %797 }
 0x213   : > { %v800_v47 = vpop.xlane.xlu0 %799  ;;  %2264 = vpow2.f32 %v841_v30  ;;  %v816_v59 = vsub.f32 %v2855_v60, %v798_v51  ;;  %861 = vadd.xlane.f32.xlu1 %v3022_v53  ;;  %863 = vadd.xlane.f32.xlu0 %v3024_v50 }
 0x214   : > { %v817_v56 = vsub.f32 %v2857_v61, %v800_v47  ;;  %2266 = vpow2.f32 %v843_v46 }
 0x215   : > { %v3030_v57 = vpop.eup %2256  ;;  %v845_v4 = vmul.f32 1.442695, %v816_v59 }
 0x216   : > { %v847_v54 = vmul.f32 1.442695, %v817_v56  ;;  %v3032_v58 = vpop.eup %2258  ;;  %v802_v25 = vpop.xlane.xlu1 %801 }
 0x217   : > { %2268 = vpow2.f32 %v845_v4  ;;  %v818_v1 = vsub.f32 %v2861_v62, %v802_v25  ;;  %865 = vadd.xlane.f32.xlu1 %v3030_v57  ;;  %867 = vadd.xlane.f32.xlu0 %v3032_v58 }
 0x218   : > { %2270 = vpow2.f32 %v847_v54 }
 0x219   : > { %v3037_v60 = vpop.eup %2260  ;;  %v849_v13 = vmul.f32 1.442695, %v818_v1 }
 0x21a   : > { %v3039_v61 = vpop.eup %2262 }
 0x21b   : > { %2272 = vpow2.f32 %v849_v13  ;;  %869 = vadd.xlane.f32.xlu1 %v3037_v60  ;;  %871 = vadd.xlane.f32.xlu0 %v3039_v61 }
 0x21d   : > { %v3043_v2 = vpop.eup %2264 }
 0x21e   : > { %v3045_v6 = vpop.eup %2266 }
 0x21f   : > { %873 = vadd.xlane.f32.xlu1 %v3043_v2  ;;  %875 = vadd.xlane.f32.xlu0 %v3045_v6 }
 0x221   : > { %v3049_v62 = vpop.eup %2268 }
 0x222   : > { %v3051_v5 = vpop.eup %2270 }
 0x223   : > { %877 = vadd.xlane.f32.xlu1 %v3049_v62  ;;  %879 = vadd.xlane.f32.xlu0 %v3051_v5 }
 0x225   : > { %v3055_v18 = vpop.eup %2272 }
 0x227   : > { %881 = vadd.xlane.f32.xlu1 %v3055_v18 }
 0x26e   : > { %v1942_v63 = vpop.f32.mrb[32].mxu0 }
 0x26f   : > { %v1943_v19 = vpop.f32.mrb[33].mxu0 }
 0x270   : > { %v3058_v11 = vadd.f32 %v1943_v19, %v1942_v63 }
 0x272   : > { %v1945_v15 = vpop.f32.mrb[34].mxu0 }
 0x273   : > { %v1946_v3 = vpop.f32.mrb[35].mxu0 }
 0x274   : > { %v3060_v38 = vadd.f32 %v1946_v3, %v1945_v15 }
 0x276   : > { %v3065_v32 = vpop.f32.mrb[36].mxu0 }
 0x293   : > { %v852_v22 = vpop.xlane.xlu0 %851 }
 0x294   : > { %2274 = vrcp.f32 %v852_v22 }
 0x297   : > { %v856_v29 = vpop.xlane.xlu0 %855 }
 0x298   : > { %v854_v20 = vpop.xlane.xlu1 %853  ;;  %2276 = vrcp.f32 %v856_v29 }
 0x299   : > { %2278 = vrcp.f32 %v854_v20 }
 0x29c   : > { %v858_v21 = vpop.xlane.xlu1 %857  ;;  %v860_v7 = vpop.xlane.xlu0 %859 }
 0x29d   : > { %2280 = vrcp.f32 %v858_v21 }
 0x29e   : > { %v2275_v27 = vpop.eup %2274  ;;  %2282 = vrcp.f32 %v860_v7 }
 0x29f   : > { %v899_v16 = vmul.f32 %v2275_v27, %v852_v22 }
 0x2a0   : > { %v862_v14 = vpop.xlane.xlu1 %861  ;;  %v864_v34 = vpop.xlane.xlu0 %863 }
 0x2a1   : > { %v915_v33 = vsub.f32 2.0, %v899_v16  ;;  %2284 = vrcp.f32 %v862_v14 }
 0x2a2   : > { %v2277_v9 = vpop.eup %2276  ;;  %2286 = vrcp.f32 %v864_v34 }
 0x2a3   : > { %v2279_v37 = vpop.eup %2278  ;;  %v931_v31 = vmul.f32 %v2275_v27, %v915_v33  ;;  %v901_v8 = vmul.f32 %v2277_v9, %v856_v29 }
 0x2a4   : > { %v900_v40 = vmul.f32 %v2279_v37, %v854_v20  ;;  %v866_v41 = vpop.xlane.xlu1 %865  ;;  %v868_v10 = vpop.xlane.xlu0 %867 }
 0x2a5   : > { %v917_v44 = vsub.f32 2.0, %v901_v8  ;;  %2288 = vrcp.f32 %v866_v41  ;;  %v3063_v28 = vmul.f32 %v3001_v36, %v931_v31 }
 0x2a6   : > { %v916_v12 = vsub.f32 2.0, %v900_v40  ;;  %2290 = vrcp.f32 %v868_v10 }
 0x2a7   : > { %v2281_v35 = vpop.eup %2280  ;;  %v933_v48 = vmul.f32 %v2277_v9, %v917_v44  ;;  %963 = vmax.xlane.f32.xlu0 %v3063_v28 }
 0x2a8   : > { %v2283_v24 = vpop.eup %2282  ;;  %v932_v55 = vmul.f32 %v2279_v37, %v916_v12  ;;  %v902_v39 = vmul.f32 %v2281_v35, %v858_v21  ;;  %v870_v42 = vpop.xlane.xlu1 %869 }
 0x2a9   : > { %v872_v43 = vpop.xlane.xlu0 %871  ;;  %v903_v52 = vmul.f32 %v2283_v24, %v860_v7  ;;  %2292 = vrcp.f32 %v870_v42  ;;  %v3069_v30 = vmul.f32 %v3006_v17, %v933_v48 }
 0x2aa   : > { %v918_v36 = vsub.f32 2.0, %v902_v39  ;;  %2294 = vrcp.f32 %v872_v43  ;;  %v3072_v46 = vmul.f32 %v3008_v45, %v932_v55 }
 0x2ab   : > { %v2285_v51 = vpop.eup %2284  ;;  %v919_v47 = vsub.f32 2.0, %v903_v52  ;;  %967 = vmax.xlane.f32.xlu0 %v3069_v30 }
 0x2ac   : > { %v2287_v59 = vpop.eup %2286  ;;  %v934_v56 = vmul.f32 %v2281_v35, %v918_v36  ;;  %v904_v4 = vmul.f32 %v2285_v51, %v862_v14  ;;  %965 = vmax.xlane.f32.xlu1 %v3072_v46  ;;  %v1323_v54 = vadd.f32 %v3072_v46, %v3063_v28  ;;  %v874_v25 = vpop.xlane.xlu1 %873 }
 0x2ad   : > { %v876_v17 = vpop.xlane.xlu0 %875  ;;  %v935_v1 = vmul.f32 %v2283_v24, %v919_v47  ;;  %v905_v13 = vmul.f32 %v2287_v59, %v864_v34  ;;  %2296 = vrcp.f32 %v874_v25 }
 0x2ae   : > { %v920_v22 = vsub.f32 2.0, %v904_v4  ;;  %v1324_v45 = vadd.f32 %v1323_v54, %v3069_v30  ;;  %2298 = vrcp.f32 %v876_v17  ;;  %v3080_v29 = vmul.f32 %v3014_v49, %v934_v56 }
 0x2af   : > { %v2289_v20 = vpop.eup %2288  ;;  %v921_v21 = vsub.f32 2.0, %v905_v13  ;;  %v3083_v7 = vmul.f32 %v3016_v23, %v935_v1 }
 0x2b0   : > { %v2291_v63 = vpop.eup %2290  ;;  %v936_v27 = vmul.f32 %v2285_v51, %v920_v22  ;;  %v906_v19 = vmul.f32 %v2289_v20, %v866_v41  ;;  %969 = vmax.xlane.f32.xlu1 %v3080_v29  ;;  %v1325_v16 = vadd.f32 %v1324_v45, %v3080_v29  ;;  %v878_v14 = vpop.xlane.xlu1 %877 }
 0x2b1   : > { %v880_v34 = vpop.xlane.xlu0 %879  ;;  %v937_v33 = vmul.f32 %v2287_v59, %v921_v21  ;;  %v907_v15 = vmul.f32 %v2291_v63, %v868_v10  ;;  %2300 = vrcp.f32 %v878_v14  ;;  %971 = vmax.xlane.f32.xlu0 %v3083_v7 }
 0x2b2   : > { %v922_v49 = vsub.f32 2.0, %v906_v19  ;;  %v1326_v9 = vadd.f32 %v1325_v16, %v3083_v7  ;;  %2302 = vrcp.f32 %v880_v34  ;;  %v3090_v23 = vmul.f32 %v3022_v53, %v936_v27 }
 0x2b3   : > { %v2293_v3 = vpop.eup %2292  ;;  %v923_v37 = vsub.f32 2.0, %v907_v15  ;;  %v3093_v31 = vmul.f32 %v3024_v50, %v937_v33  ;;  %v1949_v50 = vpop.f32.mrb[37].mxu0 }
 0x2b4   : > { %v2295_v8 = vpop.eup %2294  ;;  %v938_v40 = vmul.f32 %v2289_v20, %v922_v49  ;;  %v908_v41 = vmul.f32 %v2293_v3, %v870_v42  ;;  %973 = vmax.xlane.f32.xlu1 %v3090_v23  ;;  %v1327_v10 = vadd.f32 %v1326_v9, %v3090_v23  ;;  %v882_v44 = vpop.xlane.xlu1 %881  ;;  %v3106_v52 = vadd.f32 %v1949_v50, %v3065_v32 }
 0x2b5   : > { %v939_v12 = vmul.f32 %v2291_v63, %v923_v37  ;;  %v909_v35 = vmul.f32 %v2295_v8, %v872_v43  ;;  %2304 = vrcp.f32 %v882_v44  ;;  %975 = vmax.xlane.f32.xlu0 %v3093_v31  ;;  %v1951_v36 = vpop.f32.mrb[38].mxu0  ;;  %v1954_v43 = vpop.f32.mrb[16].mxu1 }
 0x2b6   : > { %v924_v53 = vsub.f32 2.0, %v908_v41  ;;  %v1328_v48 = vadd.f32 %v1327_v10, %v3093_v31  ;;  %v3100_v24 = vmul.f32 %v3030_v57, %v938_v40  ;;  %v1952_v32 = vpop.f32.mrb[39].mxu0  ;;  %v1955_v13 = vpop.f32.mrb[17].mxu1 }
 0x2b7   : > { %v2297_v55 = vpop.eup %2296  ;;  %v925_v39 = vsub.f32 2.0, %v909_v35  ;;  %v3103_v42 = vmul.f32 %v3032_v58, %v939_v12  ;;  %v3118_v20 = vadd.f32 %v1952_v32, %v1951_v36  ;;  %v3120_v21 = vadd.f32 %v1955_v13, %v1954_v43 }
 0x2b8   : > { %v2299_v51 = vpop.eup %2298  ;;  %v940_v47 = vmul.f32 %v2293_v3, %v924_v53  ;;  %v910_v59 = vmul.f32 %v2297_v55, %v874_v25  ;;  %977 = vmax.xlane.f32.xlu1 %v3100_v24  ;;  %v1329_v56 = vadd.f32 %v1328_v48, %v3100_v24 }
 0x2b9   : > { %v941_v57 = vmul.f32 %v2295_v8, %v925_v39  ;;  %v911_v4 = vmul.f32 %v2299_v51, %v876_v17  ;;  %979 = vmax.xlane.f32.xlu0 %v3103_v42  ;;  %v1957_v17 = vpop.f32.mrb[18].mxu1 }
 0x2ba   : > { %v926_v54 = vsub.f32 2.0, %v910_v59  ;;  %v1330_v58 = vadd.f32 %v1329_v56, %v3103_v42  ;;  %v3113_v1 = vmul.f32 %v3037_v60, %v940_v47  ;;  %v1958_v16 = vpop.f32.mrb[19].mxu1 }
 0x2bb   : > { %v2301_v22 = vpop.eup %2300  ;;  %v927_v45 = vsub.f32 2.0, %v911_v4  ;;  %v3116_v25 = vmul.f32 %v3039_v61, %v941_v57  ;;  %v1960_v49 = vpop.f32.mrb[20].mxu1  ;;  %v3129_v37 = vadd.f32 %v1958_v16, %v1957_v17 }
 0x2bc   : > { %v2303_v63 = vpop.eup %2302  ;;  %v942_v27 = vmul.f32 %v2297_v55, %v926_v54  ;;  %v912_v19 = vmul.f32 %v2301_v22, %v878_v14  ;;  %981 = vmax.xlane.f32.xlu1 %v3113_v1  ;;  %v1331_v60 = vadd.f32 %v1330_v58, %v3113_v1  ;;  %v1961_v8 = vpop.f32.mrb[21].mxu1 }
 0x2bd   : > { %v943_v33 = vmul.f32 %v2299_v51, %v927_v45  ;;  %v913_v15 = vmul.f32 %v2303_v63, %v880_v34  ;;  %983 = vmax.xlane.f32.xlu0 %v3116_v25  ;;  %v3134_v10 = vadd.f32 %v1961_v8, %v1960_v49  ;;  %v1963_v34 = vpop.f32.mrb[22].mxu1 }
 0x2be   : > { %v928_v61 = vsub.f32 2.0, %v912_v19  ;;  %v1332_v9 = vadd.f32 %v1331_v60, %v3116_v25  ;;  %v3127_v3 = vmul.f32 %v3043_v2, %v942_v27  ;;  %v1964_v48 = vpop.f32.mrb[23].mxu1 }
 0x2bf   : > { %v2305_v14 = vpop.eup %2304  ;;  %v929_v40 = vsub.f32 2.0, %v913_v15  ;;  %v3132_v41 = vmul.f32 %v3045_v6, %v943_v33  ;;  %v3139_v50 = vadd.f32 %v1964_v48, %v1963_v34  ;;  %v1966_v55 = vpop.f32.mrb[24].mxu1  ;;  %v3184_v48 = vld [vmem:[%s3656_s4] ss:$0 sm:$0xff] }
 0x2c0   : > { %v944_v12 = vmul.f32 %v2301_v22, %v928_v61  ;;  %v914_v35 = vmul.f32 %v2305_v14, %v882_v44  ;;  %985 = vmax.xlane.f32.xlu1 %v3127_v3  ;;  %v1333_v53 = vadd.f32 %v1332_v9, %v3127_v3  ;;  %v1967_v43 = vpop.f32.mrb[25].mxu1 }
 0x2c1   : > { %v945_v2 = vmul.f32 %v2303_v63, %v929_v40  ;;  %987 = vmax.xlane.f32.xlu0 %v3132_v41  ;;  %v3148_v51 = vadd.f32 %v1967_v43, %v1966_v55  ;;  %v1969_v47 = vpop.f32.mrb[26].mxu1  ;;  %v3189_v55 = vand.u32 127, %v450_v26  ;;  %v1488_v26 = vadd.f32 %v3060_v38, %v3184_v48 }
 0x2c2   : > { %v930_v39 = vsub.f32 2.0, %v914_v35  ;;  %v1334_v6 = vadd.f32 %v1333_v53, %v3132_v41  ;;  %v3143_v36 = vmul.f32 %v3049_v62, %v944_v12  ;;  %v1970_v57 = vpop.f32.mrb[27].mxu1 }
 0x2c3   : > { %v3146_v44 = vmul.f32 %v3051_v5, %v945_v2  ;;  %v3153_v4 = vadd.f32 %v1970_v57, %v1969_v47  ;;  %v1972_v54 = vpop.f32.mrb[28].mxu1  ;;  %v1483_v2 = vadd.f32 %v3058_v11, %v3184_v48  ;;  %v1493_v11 = vadd.f32 %v3106_v52, %v3184_v48 }
 0x2c4   : > { %v946_v59 = vmul.f32 %v2305_v14, %v930_v39  ;;  %989 = vmax.xlane.f32.xlu1 %v3143_v36  ;;  %v1335_v56 = vadd.f32 %v1334_v6, %v3143_v36  ;;  %v1973_v5 = vpop.f32.mrb[29].mxu1  ;;  %v1498_v57 = vadd.f32 %v3118_v20, %v3184_v48 }
 0x2c5   : > { %991 = vmax.xlane.f32.xlu0 %v3146_v44  ;;  %v3159_v32 = vadd.f32 %v1973_v5, %v1972_v54  ;;  %v1975_v13 = vpop.f32.mrb[30].mxu1 }
 0x2c6   : > { %v1336_v62 = vadd.f32 %v1335_v56, %v3146_v44  ;;  %v3157_v58 = vmul.f32 %v3055_v18, %v946_v59  ;;  %v1976_v45 = vpop.f32.mrb[31].mxu1 }
 0x2c7   : > { %v3163_v17 = vadd.f32 %v1976_v45, %v1975_v13  ;;  %v1978_v63 = vpop.f32.mrb[32].mxu1 }
 0x2c8   : > { %993 = vmax.xlane.f32.xlu1 %v3157_v58  ;;  %v1337_v22 = vadd.f32 %v1336_v62, %v3157_v58  ;;  %v1979_v19 = vpop.f32.mrb[33].mxu1 }
 0x2c9   : > { %v3165_v60 = vadd.f32 %v1979_v19, %v1978_v63  ;;  %v1981_v18 = vpop.f32.mrb[34].mxu1  ;;  %v1513_v19 = vadd.f32 %v3134_v10, %v3184_v48 }
 0x2ca   : > { %v1338_v27 = vrot.slane %v1337_v22, 4  ;;  %v1982_v33 = vpop.f32.mrb[35].mxu1 }
 0x2cb   : > { %v3167_v15 = vadd.f32 %v1982_v33, %v1981_v18  ;;  %v1984_v49 = vpop.f32.mrb[36].mxu1  ;;  %v1518_v18 = vadd.f32 %v3139_v50, %v3184_v48 }
 0x2cc   : > { %v1339_v16 = vadd.f32 %v1338_v27, %v1337_v22  ;;  %v1985_v9 = vpop.f32.mrb[37].mxu1  ;;  %v1508_v22 = vadd.f32 %v3129_v37, %v3184_v48 }
 0x2cd   : > { %v3169_v8 = vadd.f32 %v1985_v9, %v1984_v49  ;;  %v1987_v40 = vpop.f32.mrb[38].mxu1 }
 0x2ce   : > { %v1340_v61 = vrot.slane %v1339_v16, 2  ;;  %v1988_v12 = vpop.f32.mrb[39].mxu1 }
 0x2cf   : > { %v3171_v35 = vadd.f32 %v1988_v12, %v1987_v40 }
 0x2d0   : > { %v1341_v14 = vadd.f32 %v1340_v61, %v1339_v16  ;;  %v1523_v61 = vadd.f32 %v3148_v51, %v3184_v48 }
 0x2d2   : > { %v1342_v34 = vrot.slane %v1341_v14, 1 }
 0x2d4   : > { %v1343_v53 = vadd.f32 %v1342_v34, %v1341_v14 }
 0x2d6   : > { %1344 = vst [vmem:[%s3667_s10] sm:$0x1] %v1343_v53 }
 0x334   : > { %v964_v39 = vpop.xlane.xlu0 %963 }
 0x335   : > { %vm997_vm1 = vcmp.ge.f32.partialorder %v3063_v28, %v964_v39  ;;  %v1561_v6 = vmul.f32 %v1483_v2, %v964_v39  ;;  %1594 = vst.msk [vmem:[%s3194_s22] sm:$0xff] %vm1593_vm0, %v964_v39  ;;  %v1533_v39 = vadd.f32 %v3159_v32, %v3184_v48 }
 0x336   : > { %v3204_v43 = vsel %vm997_vm1, %v3189_v55, 128 }
 0x337   : > { %1577 = vst [vmem:[%s3208_s11] sm:$0xff] %v1561_v6  ;;  %v1030_v28 = vshra.s32 %v3204_v43, 16 }
 0x338   : > { %v968_v47 = vpop.xlane.xlu0 %967 }
 0x339   : > { %v966_v59 = vpop.xlane.xlu1 %965  ;;  %vm999_vm2 = vcmp.ge.f32.partialorder %v3069_v30, %v968_v47  ;;  %v1563_v52 = vmul.f32 %v1493_v11, %v968_v47  ;;  %1596 = vst.msk [vmem:[%s3194_s22 + $0x10] sm:$0xff] %vm1593_vm0, %v968_v47  ;;  %v3215_v38 = vcvt.s32.f32 %v1030_v28  ;;  %v1503_v30 = vadd.f32 %v3120_v21, %v3184_v48 }
 0x33a   : > { %vm998_vm3 = vcmp.ge.f32.partialorder %v3072_v46, %v966_v59  ;;  %v1562_v56 = vmul.f32 %v1488_v26, %v966_v59  ;;  %1595 = vst.msk [vmem:[%s3194_s22 + $0x8] sm:$0xff] %vm1593_vm0, %v966_v59  ;;  %v3223_v54 = vsel %vm999_vm2, %v3189_v55, 128 }
 0x33b   : > { %1579 = vst [vmem:[%s3208_s11 + $0x10] sm:$0xff] %v1563_v52  ;;  %1033 = vmin.xlane.f32.xlu0 %v3215_v38  ;;  %v3230_v62 = vsel %vm998_vm3, %v3189_v55, 128  ;;  %v1058_v46 = vshra.s32 %v3223_v54, 16 }
 0x33c   : > { %1578 = vst [vmem:[%s3208_s11 + $0x8] sm:$0xff] %v1562_v56  ;;  %v1044_v5 = vshra.s32 %v3230_v62, 16  ;;  %v1543_v56 = vadd.f32 %v3165_v60, %v3184_v48 }
 0x33d   : > { %v970_v20 = vpop.xlane.xlu1 %969  ;;  %v3235_v13 = vcvt.s32.f32 %v1058_v46 }
 0x33e   : > { %vm1000_vm4 = vcmp.ge.f32.partialorder %v3080_v29, %v970_v20  ;;  %v1564_v21 = vmul.f32 %v1498_v57, %v970_v20  ;;  %1597 = vst.msk [vmem:[%s3194_s22 + $0x18] sm:$0xff] %vm1593_vm0, %v970_v20  ;;  %v972_v45 = vpop.xlane.xlu0 %971  ;;  %v3242_v63 = vcvt.s32.f32 %v1044_v5 }
 0x33f   : > { %vm1001_vm5 = vcmp.ge.f32.partialorder %v3083_v7, %v972_v45  ;;  %v1565_v27 = vmul.f32 %v1503_v30, %v972_v45  ;;  %1598 = vst.msk [vmem:[%s3194_s22 + $0x20] sm:$0xff] %vm1593_vm0, %v972_v45  ;;  %1061 = vmin.xlane.f32.xlu0 %v3235_v13  ;;  %v3251_v37 = vsel %vm1000_vm4, %v3189_v55, 128  ;;  %v1553_v45 = vadd.f32 %v3169_v8, %v3184_v48 }
 0x340   : > { %1580 = vst [vmem:[%s3208_s11 + $0x18] sm:$0xff] %v1564_v21  ;;  %1047 = vmin.xlane.f32.xlu1 %v3242_v63  ;;  %v1072_v29 = vshra.s32 %v3251_v37, 16  ;;  %v3257_v7 = vsel %vm1001_vm5, %v3189_v55, 128 }
 0x341   : > { %1581 = vst [vmem:[%s3208_s11 + $0x20] sm:$0xff] %v1565_v27  ;;  %v974_v10 = vpop.xlane.xlu1 %973  ;;  %v1086_v16 = vshra.s32 %v3257_v7, 16 }
 0x342   : > { %vm1002_vm6 = vcmp.ge.f32.partialorder %v3090_v23, %v974_v10  ;;  %v1566_v33 = vmul.f32 %v1508_v22, %v974_v10  ;;  %1599 = vst.msk [vmem:[%s3194_s22 + $0x28] sm:$0xff] %vm1593_vm0, %v974_v10  ;;  %v976_v49 = vpop.xlane.xlu0 %975  ;;  %v3268_v9 = vcvt.s32.f32 %v1072_v29 }
 0x343   : > { %vm1003_vm7 = vcmp.ge.f32.partialorder %v3093_v31, %v976_v49  ;;  %v1567_v14 = vmul.f32 %v1513_v19, %v976_v49  ;;  %1600 = vst.msk [vmem:[%s3194_s22 + $0x30] sm:$0xff] %vm1593_vm0, %v976_v49  ;;  %v3273_v50 = vcvt.s32.f32 %v1086_v16  ;;  %v3276_v40 = vsel %vm1002_vm6, %v3189_v55, 128 }
 0x344   : > { %1582 = vst [vmem:[%s3208_s11 + $0x28] sm:$0xff] %v1566_v33  ;;  %1075 = vmin.xlane.f32.xlu1 %v3268_v9  ;;  %v1100_v23 = vshra.s32 %v3276_v40, 16  ;;  %v3282_v51 = vsel %vm1003_vm7, %v3189_v55, 128  ;;  %v1528_v31 = vadd.f32 %v3153_v4, %v3184_v48  ;;  %v1558_v33 = vadd.f32 %v3171_v35, %v3184_v48 }
 0x345   : > { %1583 = vst [vmem:[%s3208_s11 + $0x30] sm:$0xff] %v1567_v14  ;;  %1089 = vmin.xlane.f32.xlu0 %v3273_v50  ;;  %v978_v34 = vpop.xlane.xlu1 %977  ;;  %v1114_v12 = vshra.s32 %v3282_v51, 16 }
 0x346   : > { %vm1004_vm8 = vcmp.ge.f32.partialorder %v3100_v24, %v978_v34  ;;  %v1568_v53 = vmul.f32 %v1518_v18, %v978_v34  ;;  %1601 = vst.msk [vmem:[%s3194_s22 + $0x38] sm:$0xff] %vm1593_vm0, %v978_v34  ;;  %v980_v2 = vpop.xlane.xlu0 %979  ;;  %v3294_v6 = vcvt.s32.f32 %v1100_v23 }
 0x347   : > { %vm1005_vm9 = vcmp.ge.f32.partialorder %v3103_v42, %v980_v2  ;;  %v1569_v4 = vmul.f32 %v1523_v61, %v980_v2  ;;  %1602 = vst.msk [vmem:[%s3194_s22 + $0x40] sm:$0xff] %vm1593_vm0, %v980_v2  ;;  %v3299_v11 = vcvt.s32.f32 %v1114_v12  ;;  %v3302_v26 = vsel %vm1004_vm8, %v3189_v55, 128 }
 0x348   : > { %1584 = vst [vmem:[%s3208_s11 + $0x38] sm:$0xff] %v1568_v53  ;;  %1103 = vmin.xlane.f32.xlu1 %v3294_v6  ;;  %v1128_v24 = vshra.s32 %v3302_v26, 16  ;;  %v3308_v32 = vsel %vm1005_vm9, %v3189_v55, 128  ;;  %v1538_v42 = vadd.f32 %v3163_v17, %v3184_v48 }
 0x349   : > { %1585 = vst [vmem:[%s3208_s11 + $0x40] sm:$0xff] %v1569_v4  ;;  %1117 = vmin.xlane.f32.xlu0 %v3299_v11  ;;  %v982_v28 = vpop.xlane.xlu1 %981  ;;  %v1142_v47 = vshra.s32 %v3308_v32, 16 }
 0x34a   : > { %vm1006_vm10 = vcmp.ge.f32.partialorder %v3113_v1, %v982_v28  ;;  %v1570_v59 = vmul.f32 %v1528_v31, %v982_v28  ;;  %1603 = vst.msk [vmem:[%s3194_s22 + $0x48] sm:$0xff] %vm1593_vm0, %v982_v28  ;;  %v984_v52 = vpop.xlane.xlu0 %983  ;;  %v3320_v57 = vcvt.s32.f32 %v1128_v24  ;;  %v1043_v28 = vand.u32 65535, %v3230_v62 }
 0x34b   : > { %vm1007_vm11 = vcmp.ge.f32.partialorder %v3116_v25, %v984_v52  ;;  %v1571_v17 = vmul.f32 %v1533_v39, %v984_v52  ;;  %1604 = vst.msk [vmem:[%s3194_s22 + $0x50] sm:$0xff] %vm1593_vm0, %v984_v52  ;;  %v3325_v30 = vcvt.s32.f32 %v1142_v47  ;;  %v3328_v46 = vsel %vm1006_vm10, %v3189_v55, 128 }
 0x34c   : > { %1586 = vst [vmem:[%s3208_s11 + $0x48] sm:$0xff] %v1570_v59  ;;  %1131 = vmin.xlane.f32.xlu1 %v3320_v57  ;;  %v1156_v1 = vshra.s32 %v3328_v46, 16  ;;  %v3334_v60 = vsel %vm1007_vm11, %v3189_v55, 128  ;;  %v1548_v25 = vadd.f32 %v3167_v15, %v3184_v48 }
 0x34d   : > { %1587 = vst [vmem:[%s3208_s11 + $0x50] sm:$0xff] %v1571_v17  ;;  %1145 = vmin.xlane.f32.xlu0 %v3325_v30  ;;  %v986_v5 = vpop.xlane.xlu1 %985  ;;  %v1170_v20 = vshra.s32 %v3334_v60, 16  ;;  %v1045_v17 = vcvt.s32.f32 %v1043_v28 }
 0x34e   : > { %vm1008_vm12 = vcmp.ge.f32.partialorder %v3127_v3, %v986_v5  ;;  %v1572_v22 = vmul.f32 %v1538_v42, %v986_v5  ;;  %1605 = vst.msk [vmem:[%s3194_s22 + $0x58] sm:$0xff] %vm1593_vm0, %v986_v5  ;;  %v988_v21 = vpop.xlane.xlu0 %987  ;;  %v3346_v27 = vcvt.s32.f32 %v1156_v1  ;;  %v1057_v42 = vand.u32 65535, %v3223_v54 }
 0x34f   : > { %vm1009_vm13 = vcmp.ge.f32.partialorder %v3132_v41, %v988_v21  ;;  %v1573_v15 = vmul.f32 %v1543_v56, %v988_v21  ;;  %1606 = vst.msk [vmem:[%s3194_s22 + $0x60] sm:$0xff] %vm1593_vm0, %v988_v21  ;;  %v3351_v19 = vcvt.s32.f32 %v1170_v20  ;;  %v3354_v29 = vsel %vm1008_vm12, %v3189_v55, 128 }
 0x350   : > { %1588 = vst [vmem:[%s3208_s11 + $0x58] sm:$0xff] %v1572_v22  ;;  %1159 = vmin.xlane.f32.xlu1 %v3346_v27  ;;  %v1184_v3 = vshra.s32 %v3354_v29, 16  ;;  %v3360_v8 = vsel %vm1009_vm13, %v3189_v55, 128  ;;  %v1059_v52 = vcvt.s32.f32 %v1057_v42  ;;  %v1099_v5 = vand.u32 65535, %v3276_v40 }
 0x351   : > { %1589 = vst [vmem:[%s3208_s11 + $0x60] sm:$0xff] %v1573_v15  ;;  %1173 = vmin.xlane.f32.xlu0 %v3351_v19  ;;  %v990_v41 = vpop.xlane.xlu1 %989  ;;  %v1198_v18 = vshra.s32 %v3360_v8, 16  ;;  %v1127_v40 = vand.u32 65535, %v3302_v26  ;;  %v1155_v26 = vand.u32 65535, %v3328_v46  ;;  %v1183_v46 = vand.u32 65535, %v3354_v29 }
 0x352   : > { %vm1010_vm14 = vcmp.ge.f32.partialorder %v3143_v36, %v990_v41  ;;  %v1574_v10 = vmul.f32 %v1548_v25, %v990_v41  ;;  %1607 = vst.msk [vmem:[%s3194_s22 + $0x68] sm:$0xff] %vm1593_vm0, %v990_v41  ;;  %v992_v16 = vpop.xlane.xlu0 %991  ;;  %v3370_v49 = vcvt.s32.f32 %v1184_v3  ;;  %v1101_v21 = vcvt.s32.f32 %v1099_v5 }
 0x353   : > { %vm1011_vm15 = vcmp.ge.f32.partialorder %v3146_v44, %v992_v16  ;;  %v1575_v61 = vmul.f32 %v1553_v45, %v992_v16  ;;  %1608 = vst.msk [vmem:[%s3194_s22 + $0x70] sm:$0xff] %vm1593_vm0, %v992_v16  ;;  %v3375_v14 = vcvt.s32.f32 %v1198_v18  ;;  %v3378_v36 = vsel %vm1010_vm14, %v3189_v55, 128 }
 0x354   : > { %1590 = vst [vmem:[%s3208_s11 + $0x68] sm:$0xff] %v1574_v10  ;;  %1187 = vmin.xlane.f32.xlu1 %v3370_v49  ;;  %v1212_v23 = vshra.s32 %v3378_v36, 16  ;;  %v3384_v35 = vsel %vm1011_vm15, %v3189_v55, 128  ;;  %v1129_v41 = vcvt.s32.f32 %v1127_v40  ;;  %v1211_v29 = vand.u32 65535, %v3378_v36 }
 0x355   : > { %1591 = vst [vmem:[%s3208_s11 + $0x70] sm:$0xff] %v1575_v61  ;;  %1201 = vmin.xlane.f32.xlu0 %v3375_v14  ;;  %v994_v44 = vpop.xlane.xlu1 %993  ;;  %v1226_v48 = vshra.s32 %v3384_v35, 16 }
 0x356   : > { %vm1012_vm1 = vcmp.ge.f32.partialorder %v3157_v58, %v994_v44  ;;  %v1576_v31 = vmul.f32 %v1558_v33, %v994_v44  ;;  %1609 = vst.msk [vmem:[%s3194_s22 + $0x78] sm:$0xff] %vm1593_vm0, %v994_v44  ;;  %v3392_v34 = vcvt.s32.f32 %v1212_v23  ;;  %v1029_v58 = vand.u32 65535, %v3204_v43  ;;  %s2396_s22 = sshll.u32 %s2532_s25, 4  ;;  %s2397_s22 = int_to_ptr.vmem [resolvable:$false] %s2396_s22 }
 0x357   : > { %v3394_v12 = vcvt.s32.f32 %v1226_v48  ;;  %v3397_v53 = vsel %vm1012_vm1, %v3189_v55, 128  ;;  %v1071_v43 = vand.u32 65535, %v3251_v37  ;;  %v1113_v37 = vand.u32 65535, %v3282_v51  ;;  %p2399_p13 = scmp.lt.s32.totalorder %s3493_s13, %s2397_s22 }
 0x358   : > { %1592 = vst [vmem:[%s3208_s11 + $0x78] sm:$0xff] %v1576_v31  ;;  %1215 = vmin.xlane.f32.xlu1 %v3392_v34  ;;  %v1240_v2 = vshra.s32 %v3397_v53, 16  ;;  %v1031_v24 = vcvt.s32.f32 %v1029_v58  ;;  %v1141_v51 = vand.u32 65535, %v3308_v32  ;;  %v1169_v32 = vand.u32 65535, %v3334_v60  ;;  %s2398_s11 = scalar_lea.vmem %s2397_s22, 4096 }
 0x359   : > { %1229 = vmin.xlane.f32.xlu0 %v3394_v12  ;;  %v1073_v25 = vcvt.s32.f32 %v1071_v43  ;;  %v1157_v33 = vcvt.s32.f32 %v1155_v26  ;;  %v1197_v60 = vand.u32 65535, %v3360_v8  ;;  %v1185_v48 = vcvt.s32.f32 %v1183_v46  ;;  %p2400_p3 = scmp.lt.s32.totalorder %s2398_s11, %s2392_s26 }
 0x35a   : > { %v3403_v39 = vcvt.s32.f32 %v1240_v2  ;;  %v1225_v8 = vand.u32 65535, %v3384_v35  ;;  %v1239_v36 = vand.u32 65535, %v3397_v53 }
 0x35b   : > { %p2401_p7 = por %p2400_p3, %p2399_p13 }
 0x35c   : > { %1243 = vmin.xlane.f32.xlu1 %v3403_v39 }
 0x35d   : > { %p2402_p9 = pnand %p2401_p7, %p2395_p8 }
 0x3c8   : > { %v3407_v4 = vpop.xlane.xlu0 %1033 }
 0x3c9   : > { %vm1035_vm0 = vcmp.eq.f32.partialorder %v3215_v38, %v3407_v4  ;;  %v1085_v38 = vand.u32 65535, %v3257_v7 }
 0x3ca   : > { %v1036_v47 = vsel %vm1035_vm0, %v1031_v24, inf  ;;  %v1213_v24 = vcvt.s32.f32 %v1211_v29 }
 0x3cb   : > { %1037 = vmin.xlane.f32.xlu0 %v1036_v47  ;;  %v1241_v47 = vcvt.s32.f32 %v1239_v36 }
 0x3cc   : > { %v3413_v59 = vpop.xlane.xlu0 %1061 }
 0x3cd   : > { %v3415_v56 = vpop.xlane.xlu1 %1047  ;;  %vm1063_vm2 = vcmp.eq.f32.partialorder %v3235_v13, %v3413_v59  ;;  %v1087_v13 = vcvt.s32.f32 %v1085_v38 }
 0x3ce   : > { %vm1049_vm3 = vcmp.eq.f32.partialorder %v3242_v63, %v3415_v56  ;;  %v1064_v54 = vsel %vm1063_vm2, %v1059_v52, inf }
 0x3cf   : > { %v1050_v62 = vsel %vm1049_vm3, %v1045_v17, inf  ;;  %1065 = vmin.xlane.f32.xlu0 %v1064_v54 }
 0x3d0   : > { %1051 = vmin.xlane.f32.xlu1 %v1050_v62 }
 0x3d1   : > { %v3423_v1 = vpop.xlane.xlu1 %1075 }
 0x3d2   : > { %v3426_v20 = vpop.xlane.xlu0 %1089  ;;  %vm1077_vm4 = vcmp.eq.f32.partialorder %v3268_v9, %v3423_v1  ;;  %v1115_v9 = vcvt.s32.f32 %v1113_v37 }
 0x3d3   : > { %v1078_v63 = vsel %vm1077_vm4, %v1073_v25, inf  ;;  %vm1091_vm5 = vcmp.eq.f32.partialorder %v3273_v50, %v3426_v20 }
 0x3d4   : > { %1079 = vmin.xlane.f32.xlu1 %v1078_v63  ;;  %v1092_v7 = vsel %vm1091_vm5, %v1087_v13, inf }
 0x3d5   : > { %1093 = vmin.xlane.f32.xlu0 %v1092_v7  ;;  %v3433_v22 = vpop.xlane.xlu1 %1103 }
 0x3d6   : > { %v3436_v45 = vpop.xlane.xlu0 %1117  ;;  %vm1105_vm6 = vcmp.eq.f32.partialorder %v3294_v6, %v3433_v22  ;;  %v1143_v6 = vcvt.s32.f32 %v1141_v51 }
 0x3d7   : > { %v1106_v15 = vsel %vm1105_vm6, %v1101_v21, inf  ;;  %vm1119_vm7 = vcmp.eq.f32.partialorder %v3299_v11, %v3436_v45 }
 0x3d8   : > { %1107 = vmin.xlane.f32.xlu1 %v1106_v15  ;;  %v1120_v50 = vsel %vm1119_vm7, %v1115_v9, inf }
 0x3d9   : > { %1121 = vmin.xlane.f32.xlu0 %v1120_v50  ;;  %v3443_v3 = vpop.xlane.xlu1 %1131 }
 0x3da   : > { %v3446_v18 = vpop.xlane.xlu0 %1145  ;;  %vm1133_vm8 = vcmp.eq.f32.partialorder %v3320_v57, %v3443_v3  ;;  %v1171_v57 = vcvt.s32.f32 %v1169_v32 }
 0x3db   : > { %v1134_v10 = vsel %vm1133_vm8, %v1129_v41, inf  ;;  %vm1147_vm9 = vcmp.eq.f32.partialorder %v3325_v30, %v3446_v18 }
 0x3dc   : > { %1135 = vmin.xlane.f32.xlu1 %v1134_v10  ;;  %v1148_v11 = vsel %vm1147_vm9, %v1143_v6, inf }
 0x3dd   : > { %1149 = vmin.xlane.f32.xlu0 %v1148_v11  ;;  %v3453_v16 = vpop.xlane.xlu1 %1159 }
 0x3de   : > { %v3456_v61 = vpop.xlane.xlu0 %1173  ;;  %vm1161_vm10 = vcmp.eq.f32.partialorder %v3346_v27, %v3453_v16  ;;  %v1199_v27 = vcvt.s32.f32 %v1197_v60 }
 0x3df   : > { %v1162_v23 = vsel %vm1161_vm10, %v1157_v33, inf  ;;  %vm1175_vm11 = vcmp.eq.f32.partialorder %v3351_v19, %v3456_v61 }
 0x3e0   : > { %1163 = vmin.xlane.f32.xlu1 %v1162_v23  ;;  %v1176_v30 = vsel %vm1175_vm11, %v1171_v57, inf }
 0x3e1   : > { %1177 = vmin.xlane.f32.xlu0 %v1176_v30  ;;  %v3463_v44 = vpop.xlane.xlu1 %1187 }
 0x3e2   : > { %v3466_v31 = vpop.xlane.xlu0 %1201  ;;  %vm1189_vm12 = vcmp.eq.f32.partialorder %v3370_v49, %v3463_v44  ;;  %v1227_v49 = vcvt.s32.f32 %v1225_v8 }
 0x3e3   : > { %v1190_v2 = vsel %vm1189_vm12, %v1185_v48, inf  ;;  %vm1203_vm13 = vcmp.eq.f32.partialorder %v3375_v14, %v3466_v31 }
 0x3e4   : > { %1191 = vmin.xlane.f32.xlu1 %v1190_v2  ;;  %v1204_v19 = vsel %vm1203_vm13, %v1199_v27, inf }
 0x3e5   : > { %1205 = vmin.xlane.f32.xlu0 %v1204_v19  ;;  %v3473_v58 = vpop.xlane.xlu1 %1215 }
 0x3e6   : > { %v3476_v42 = vpop.xlane.xlu0 %1229  ;;  %vm1217_vm14 = vcmp.eq.f32.partialorder %v3392_v34, %v3473_v58 }
 0x3e7   : > { %v1218_v35 = vsel %vm1217_vm14, %v1213_v24, inf  ;;  %vm1231_vm15 = vcmp.eq.f32.partialorder %v3394_v12, %v3476_v42 }
 0x3e8   : > { %1219 = vmin.xlane.f32.xlu1 %v1218_v35  ;;  %v1232_v14 = vsel %vm1231_vm15, %v1227_v49, inf }
 0x3e9   : > { %1233 = vmin.xlane.f32.xlu0 %v1232_v14  ;;  %v3482_v28 = vpop.xlane.xlu1 %1243 }
 0x3ea   : > { %vm1245_vm1 = vcmp.eq.f32.partialorder %v3403_v39, %v3482_v28 }
 0x3eb   : > { %v1246_v53 = vsel %vm1245_vm1, %v1241_v47, inf }
 0x3ec   : > { %1247 = vmin.xlane.f32.xlu1 %v1246_v53 }
 0x3ed   : > { %2405 = shalt.err (!%p2402_p9)
}
 0x3ee   : > { %s2406_s24 = scalar_lea.hbm %s3491_s15, 2048  ;;  %s2410_s25 = scalar_lea.hbm %s3657_s5, 8192 }
 0x3ef   : > { %p2407_p12 = scmp.ne.s32.totalorder %s3491_s15, %s2406_s24  ;;  %p2411_p10 = scmp.lt.u32.totalorder %s3491_s15, %s3657_s5 }
 0x3f0   : > { %p2412_p11 = scmp.lt.u32.totalorder %s2410_s25, %s2406_s24  ;;  %p2414_p2 = scmp.lt.u32.totalorder %s2406_s24, %s3491_s15 }
 0x3f1   : > { %p2408_p0 = pnand %p2407_p12, %p2702_p6 }
 0x3f2   : > { %p2413_p1 = por %p2412_p11, %p2411_p10 }
 0x3f3   : > { %p2409_p5 = pneg %p2408_p0 }
 0x3f4   : > { %p2415_p4 = por %p2414_p2, %p2413_p1 }
 0x3f6   : > { %p2416_p8 = pnand %p2415_p4, %p2409_p5 }
 0x3f8   : > { %2419 = shalt.err (!%p2416_p8)
}
 0x3f9   : > { %s2533_s26 = smov 128   ;;  %s2534_s11 = smov 8   ;;  %v1040_v34 = vcvt.f32.s32 %v3407_v4  ;;  %v1068_v39 = vcvt.f32.s32 %v3413_v59  ;;  %v1054_v43 = vcvt.f32.s32 %v3415_v56  ;;  %v1082_v25 = vcvt.f32.s32 %v3423_v1 }
 0x3fa   : > { %2168 = dma.vmem_to_hbm [thread:$0]  (%p2702_p6), %s3493_s13, 2048, %s3491_s15, %s1611_s14, %s2533_s26, %s2533_s26, %s2534_s11   ;;  %v1096_v63 = vcvt.f32.s32 %v3426_v20  ;;  %v1110_v40 = vcvt.f32.s32 %v3433_v22  ;;  %v1124_v15 = vcvt.f32.s32 %v3436_v45  ;;  %v1138_v22 = vcvt.f32.s32 %v3443_v3 }
 0x3fb   : > { %v1041_v17 = vshll.u32 %v1040_v34, 16  ;;  %v1069_v62 = vshll.u32 %v1068_v39, 16  ;;  %v1055_v37 = vshll.u32 %v1054_v43, 16  ;;  %v1083_v59 = vshll.u32 %v1082_v25, 16  ;;  %s1620_s10 = sand.u32 1, %s2603_s9   ;;  %s369_s13 = scalar_lea.vmem [#allocation9], %s2754_s19 }
 0x3fc   : > { %v1097_v56 = vshll.u32 %v1096_v63, 16  ;;  %v1111_v32 = vshll.u32 %v1110_v40, 16  ;;  %v1152_v46 = vcvt.f32.s32 %v3446_v18  ;;  %v1125_v23 = vshll.u32 %v1124_v15, 16  ;;  %s1657_s15 = sshll.u32 %s369_s13, 4  ;;  %s3681_s14 = scalar_lea.vmem [#allocation11], %s2754_s19  ;;  %s3577_s15 = int_to_ptr.vmem [resolvable:$true] %s1657_s15 }
 0x3fd   : > { %v1139_v3 = vshll.u32 %v1138_v22, 16  ;;  %v1166_v8 = vcvt.f32.s32 %v3453_v16  ;;  %v1180_v14 = vcvt.f32.s32 %v3456_v61  ;;  %v1194_v39 = vcvt.f32.s32 %v3463_v44  ;;  %s1670_s24 = sshll.u32 %s3681_s14, 4  ;;  %s3575_s25 = scalar_lea.hbm %s3659_s7, %s3177_s17  ;;  %s3585_s24 = int_to_ptr.vmem [resolvable:$true] %s1670_s24 }
 0x3fe   : > { %v1153_v24 = vshll.u32 %v1152_v46, 16  ;;  %s3583_s9 = scalar_lea.hbm %s3660_s8, %s3177_s17  ;;  %s3587_s19 = scalar_lea.sflag [#allocation10], %s1620_s10 }
 0x3ff   : > { %v1167_v16 = vshll.u32 %v1166_v8, 16  ;;  %v1181_v25 = vshll.u32 %v1180_v14, 16  ;;  %v1195_v44 = vshll.u32 %v1194_v39, 16  ;;  %s2420_s11 = scalar_lea.vmem %s3577_s15, 16  ;;  %s2535_s14 = smov [#allocation9]  }
 0x400   : > { %p2421_p13 = scmp.ne.s32.totalorder %s3577_s15, %s2420_s11  ;;  %s2424_s21 = sshll.u32 %s2535_s14, 4  ;;  %s2425_s21 = int_to_ptr.vmem [resolvable:$false] %s2424_s21 }
 0x401   : > { %s2426_s18 = scalar_lea.vmem %s2425_s21, 32  ;;  %p2427_p9 = scmp.lt.s32.totalorder %s3577_s15, %s2425_s21 }
 0x402   : > { %p2422_p3 = pnand %p2421_p13, %p2702_p6  ;;  %p2428_p12 = scmp.lt.s32.totalorder %s2426_s18, %s2420_s11 }
 0x404   : > { %p2423_p7 = pneg %p2422_p3  ;;  %p2429_p0 = por %p2428_p12, %p2427_p9 }
 0x406   : > { %p2430_p5 = pnand %p2429_p0, %p2423_p7 }
 0x458   : > { %v1038_v12 = vpop.xlane.xlu0 %1037 }
 0x459   : > { %v1039_v52 = vcvt.f32.s32 %v1038_v12 }
 0x45b   : > { %v1042_v54 = vadd.s32 %v1041_v17, %v1039_v52 }
 0x45c   : > { %v1066_v38 = vpop.xlane.xlu0 %1065 }
 0x45d   : > { %v1052_v5 = vpop.xlane.xlu1 %1051  ;;  %v1067_v13 = vcvt.f32.s32 %v1066_v38  ;;  %vm1253_vm0 = vcmp.eq.s32.totalorder %v3189_v55, %v1042_v54  ;;  %v1208_v54 = vcvt.f32.s32 %v3466_v31 }
 0x45e   : > { %v1053_v7 = vcvt.f32.s32 %v1052_v5  ;;  %v1852_v20 = vsel %vm1253_vm0, 1.0, %v2531_v0 }
 0x45f   : > { %v1070_v21 = vadd.s32 %v1069_v62, %v1067_v13 }
 0x460   : > { %v1056_v4 = vadd.s32 %v1055_v37, %v1053_v7  ;;  %v1222_v7 = vcvt.f32.s32 %v3473_v58 }
 0x461   : > { %v1080_v9 = vpop.xlane.xlu1 %1079  ;;  %vm1255_vm3 = vcmp.eq.s32.totalorder %v3189_v55, %v1070_v21 }
 0x462   : > { %vm1254_vm2 = vcmp.eq.s32.totalorder %v3189_v55, %v1056_v4  ;;  %v1081_v1 = vcvt.f32.s32 %v1080_v9  ;;  %v1094_v51 = vpop.xlane.xlu0 %1093  ;;  %v1854_v10 = vsel %vm1255_vm3, 1.0, %v2531_v0  ;;  %v1223_v58 = vshll.u32 %v1222_v7, 16 }
 0x463   : > { %v1853_v50 = vsel %vm1254_vm2, 1.0, %v2531_v0  ;;  %v1095_v41 = vcvt.f32.s32 %v1094_v51 }
 0x464   : > { %v1301_v26 = vadd.f32 %v1853_v50, %v1852_v20  ;;  %v1084_v6 = vadd.s32 %v1083_v59, %v1081_v1  ;;  %v1209_v59 = vshll.u32 %v1208_v54, 16  ;;  %v1236_v1 = vcvt.f32.s32 %v3476_v42 }
 0x465   : > { %v1098_v11 = vadd.s32 %v1097_v56, %v1095_v41  ;;  %v1108_v33 = vpop.xlane.xlu1 %1107 }
 0x466   : > { %v1302_v57 = vadd.f32 %v1854_v10, %v1301_v26  ;;  %vm1256_vm4 = vcmp.eq.s32.totalorder %v3189_v55, %v1084_v6  ;;  %v1109_v45 = vcvt.f32.s32 %v1108_v33  ;;  %v1122_v60 = vpop.xlane.xlu0 %1121  ;;  %v1237_v42 = vshll.u32 %v1236_v1, 16 }
 0x467   : > { %v1855_v30 = vsel %vm1256_vm4, 1.0, %v2531_v0  ;;  %vm1257_vm5 = vcmp.eq.s32.totalorder %v3189_v55, %v1098_v11  ;;  %v1123_v48 = vcvt.f32.s32 %v1122_v60 }
 0x468   : > { %v1303_v29 = vadd.f32 %v1855_v30, %v1302_v57  ;;  %v1112_v27 = vadd.s32 %v1111_v32, %v1109_v45  ;;  %v1856_v2 = vsel %vm1257_vm5, 1.0, %v2531_v0  ;;  %v1250_v32 = vcvt.f32.s32 %v3482_v28 }
 0x469   : > { %v1126_v19 = vadd.s32 %v1125_v23, %v1123_v48  ;;  %v1136_v18 = vpop.xlane.xlu1 %1135 }
 0x46a   : > { %v1304_v36 = vadd.f32 %v1856_v2, %v1303_v29  ;;  %vm1258_vm6 = vcmp.eq.s32.totalorder %v3189_v55, %v1112_v27  ;;  %v1137_v49 = vcvt.f32.s32 %v1136_v18  ;;  %v1150_v35 = vpop.xlane.xlu0 %1149  ;;  %v1251_v48 = vshll.u32 %v1250_v32, 16 }
 0x46b   : > { %v1857_v47 = vsel %vm1258_vm6, 1.0, %v2531_v0  ;;  %vm1259_vm7 = vcmp.eq.s32.totalorder %v3189_v55, %v1126_v19  ;;  %v1151_v53 = vcvt.f32.s32 %v1150_v35 }
 0x46c   : > { %v1305_v34 = vadd.f32 %v1857_v47, %v1304_v36  ;;  %v1140_v12 = vadd.s32 %v1139_v3, %v1137_v49  ;;  %v1858_v52 = vsel %vm1259_vm7, 1.0, %v2531_v0 }
 0x46d   : > { %v1154_v17 = vadd.s32 %v1153_v24, %v1151_v53  ;;  %v1164_v43 = vpop.xlane.xlu1 %1163 }
 0x46e   : > { %v1306_v38 = vadd.f32 %v1858_v52, %v1305_v34  ;;  %vm1260_vm8 = vcmp.eq.s32.totalorder %v3189_v55, %v1140_v12  ;;  %v1165_v61 = vcvt.f32.s32 %v1164_v43  ;;  %v1178_v62 = vpop.xlane.xlu0 %1177 }
 0x46f   : > { %v1859_v5 = vsel %vm1260_vm8, 1.0, %v2531_v0  ;;  %vm1261_vm9 = vcmp.eq.s32.totalorder %v3189_v55, %v1154_v17  ;;  %v1179_v13 = vcvt.f32.s32 %v1178_v62 }
 0x470   : > { %v1307_v37 = vadd.f32 %v1859_v5, %v1306_v38  ;;  %v1168_v63 = vadd.s32 %v1167_v16, %v1165_v61  ;;  %v1860_v21 = vsel %vm1261_vm9, 1.0, %v2531_v0 }
 0x471   : > { %v1182_v4 = vadd.s32 %v1181_v25, %v1179_v13  ;;  %v1192_v31 = vpop.xlane.xlu1 %1191 }
 0x472   : > { %v1308_v40 = vadd.f32 %v1860_v21, %v1307_v37  ;;  %vm1262_vm10 = vcmp.eq.s32.totalorder %v3189_v55, %v1168_v63  ;;  %v1193_v9 = vcvt.f32.s32 %v1192_v31  ;;  %v1206_v56 = vpop.xlane.xlu0 %1205 }
 0x473   : > { %v1861_v51 = vsel %vm1262_vm10, 1.0, %v2531_v0  ;;  %vm1263_vm11 = vcmp.eq.s32.totalorder %v3189_v55, %v1182_v4  ;;  %v1207_v15 = vcvt.f32.s32 %v1206_v56 }
 0x474   : > { %v1309_v20 = vadd.f32 %v1861_v51, %v1308_v40  ;;  %v1196_v50 = vadd.s32 %v1195_v44, %v1193_v9  ;;  %v1862_v41 = vsel %vm1263_vm11, 1.0, %v2531_v0 }
 0x475   : > { %v1210_v26 = vadd.s32 %v1209_v59, %v1207_v15  ;;  %v1220_v6 = vpop.xlane.xlu1 %1219 }
 0x476   : > { %v1310_v22 = vadd.f32 %v1862_v41, %v1309_v20  ;;  %vm1264_vm12 = vcmp.eq.s32.totalorder %v3189_v55, %v1196_v50  ;;  %v1221_v10 = vcvt.f32.s32 %v1220_v6  ;;  %v1234_v11 = vpop.xlane.xlu0 %1233 }
 0x477   : > { %v1863_v33 = vsel %vm1264_vm12, 1.0, %v2531_v0  ;;  %vm1265_vm13 = vcmp.eq.s32.totalorder %v3189_v55, %v1210_v26  ;;  %v1235_v46 = vcvt.f32.s32 %v1234_v11 }
 0x478   : > { %v1311_v57 = vadd.f32 %v1863_v33, %v1310_v22  ;;  %v1224_v45 = vadd.s32 %v1223_v58, %v1221_v10  ;;  %v1864_v60 = vsel %vm1265_vm13, 1.0, %v2531_v0 }
 0x479   : > { %v1238_v23 = vadd.s32 %v1237_v42, %v1235_v46  ;;  %v1248_v30 = vpop.xlane.xlu1 %1247 }
 0x47a   : > { %v1312_v29 = vadd.f32 %v1864_v60, %v1311_v57  ;;  %vm1266_vm14 = vcmp.eq.s32.totalorder %v3189_v55, %v1224_v45  ;;  %v1249_v28 = vcvt.f32.s32 %v1248_v30 }
 0x47b   : > { %v1865_v27 = vsel %vm1266_vm14, 1.0, %v2531_v0  ;;  %vm1267_vm15 = vcmp.eq.s32.totalorder %v3189_v55, %v1238_v23 }
 0x47c   : > { %v1313_v3 = vadd.f32 %v1865_v27, %v1312_v29  ;;  %v1252_v8 = vadd.s32 %v1251_v48, %v1249_v28  ;;  %v1866_v2 = vsel %vm1267_vm15, 1.0, %v2531_v0 }
 0x47e   : > { %v1314_v19 = vadd.f32 %v1866_v2, %v1313_v3  ;;  %vm1268_vm1 = vcmp.eq.s32.totalorder %v3189_v55, %v1252_v8 }
 0x47f   : > { %v1867_v18 = vsel %vm1268_vm1, 1.0, %v2531_v0 }
 0x480   : > { %v1315_v24 = vadd.f32 %v1867_v18, %v1314_v19 }
 0x482   : > { %v1316_v36 = vrot.slane %v1315_v24, 4 }
 0x484   : > { %v1317_v49 = vadd.f32 %v1316_v36, %v1315_v24 }
 0x486   : > { %v1318_v35 = vrot.slane %v1317_v49, 2 }
 0x488   : > { %v1319_v14 = vadd.f32 %v1318_v35, %v1317_v49 }
 0x48a   : > { %v1320_v47 = vrot.slane %v1319_v14, 1 }
 0x48c   : > { %v1321_v55 = vadd.f32 %v1320_v47, %v1319_v14 }
 0x48e   : > { %1322 = vst [vmem:[%s369_s13] sm:$0x1] %v1321_v55 }
 0x48f   : > { %2433 = shalt.err (!%p2430_p5)
}
 0x490   : > { %s2434_s17 = scalar_lea.hbm %s3575_s25, 16  ;;  %s2438_s22 = scalar_lea.hbm %s3659_s7, 64 }
 0x491   : > { %p2435_p10 = scmp.ne.s32.totalorder %s3575_s25, %s2434_s17  ;;  %p2439_p2 = scmp.lt.u32.totalorder %s3575_s25, %s3659_s7 }
 0x492   : > { %p2440_p4 = scmp.lt.u32.totalorder %s2438_s22, %s2434_s17  ;;  %p2442_p13 = scmp.lt.u32.totalorder %s2434_s17, %s3575_s25 }
 0x493   : > { %p2436_p11 = pnand %p2435_p10, %p2702_p6 }
 0x494   : > { %p2441_p8 = por %p2440_p4, %p2439_p2 }
 0x495   : > { %p2437_p1 = pneg %p2436_p11 }
 0x496   : > { %p2443_p3 = por %p2442_p13, %p2441_p8 }
 0x498   : > { %p2444_p7 = pnand %p2443_p3, %p2437_p1 }
 0x49a   : > { %2447 = shalt.err (!%p2444_p7)
}
 0x49b   : > { %2169 = dma.vmem_to_hbm [thread:$0]  (%p2702_p6), %s3577_s15, 16, %s3575_s25, %s3587_s19  }
 0x49c   : > { %s2448_s11 = scalar_lea.vmem %s3585_s24, 16  ;;  %s2536_s21 = smov [#allocation11]  }
 0x49d   : > { %p2449_p9 = scmp.ne.s32.totalorder %s3585_s24, %s2448_s11  ;;  %s2452_s18 = sshll.u32 %s2536_s21, 4  ;;  %s2453_s18 = int_to_ptr.vmem [resolvable:$false] %s2452_s18 }
 0x49e   : > { %s2454_s17 = scalar_lea.vmem %s2453_s18, 32  ;;  %p2455_p5 = scmp.lt.s32.totalorder %s3585_s24, %s2453_s18 }
 0x49f   : > { %p2450_p12 = pnand %p2449_p9, %p2702_p6  ;;  %p2456_p10 = scmp.lt.s32.totalorder %s2454_s17, %s2448_s11 }
 0x4a1   : > { %p2451_p0 = pneg %p2450_p12  ;;  %p2457_p11 = por %p2456_p10, %p2455_p5 }
 0x4a3   : > { %p2458_p1 = pnand %p2457_p11, %p2451_p0 }
 0x4a5   : > { %2461 = shalt.err (!%p2458_p1)
}
 0x4a6   : > { %s2462_s15 = scalar_lea.hbm %s3583_s9, 16  ;;  %s2466_s13 = scalar_lea.hbm %s3660_s8, 64 }
 0x4a7   : > { %p2463_p2 = scmp.ne.s32.totalorder %s3583_s9, %s2462_s15  ;;  %p2467_p13 = scmp.lt.u32.totalorder %s3583_s9, %s3660_s8 }
 0x4a8   : > { %p2468_p3 = scmp.lt.u32.totalorder %s2466_s13, %s2462_s15  ;;  %p2470_p9 = scmp.lt.u32.totalorder %s2462_s15, %s3583_s9 }
 0x4a9   : > { %p2464_p4 = pnand %p2463_p2, %p2702_p6 }
 0x4aa   : > { %p2469_p7 = por %p2468_p3, %p2467_p13 }
 0x4ab   : > { %p2465_p8 = pneg %p2464_p4 }
 0x4ac   : > { %p2471_p12 = por %p2470_p9, %p2469_p7 }
 0x4ae   : > { %p2472_p0 = pnand %p2471_p12, %p2465_p8 }
 0x4b0   : > { %2475 = shalt.err (!%p2472_p0)
}
 0x4b1   : > { %2170 = dma.vmem_to_hbm [thread:$0]  (%p2702_p6), %s3585_s24, 16, %s3583_s9, %s3587_s19  }
 0x4b2 PF: > { %p2200_p5 = scmp.ge.s32.totalorder %s2522_s30, 2  ;;  %s1682_s14 = sand.u32 1, %s2510_s27  }
 0x4b3   : > { %p3682_p10 = scmp.ne.s32.totalorder %s3669_s12, 0  ;;  %s1683_s11 = scalar_lea.sflag [#allocation4], %s1682_s14 }
 0x4b5   : > { %p2186_p11 = pnand %p2200_p5, %p3682_p10 }
 0x4b7   : > { %2501 = dma.done.wait (!%p2186_p11), %s1683_s11, 2048  }
 0x4b8   : > { %2503 = vsyncadd (!%p2186_p11), %s1683_s11, 4294965248  ;;  %s3683_s21 = sadd.s32 4294967294, %s2522_s30  }
 0x4b9   : > { %s1699_s18 = sand.u32 1, %s3683_s21  }
 0x4ba   : > { %s1700_s17 = scalar_lea.sflag [#allocation10], %s1699_s18 }
 0x4bb   : > { %2505 = dma.done.wait (!%p2186_p11), %s1700_s17, 32  }
 0x4bc   : > { %2507 = vsyncadd (!%p2186_p11), %s1700_s17, 4294967264  ;;  %p26_p6 = scmp.ge.s32.totalorder %s2689_s20, 6   ;;  %s3684_s27 = smov %s2514_s28 }
 0x4bd   : > { %s3685_s28 = smov %s2518_s29  ;;  %s3686_s29 = smov %s2698_s23 }
 0x4be   : > { %s3687_s30 = smov %s2689_s20  ;;  %28 = sbr.rel (!%p26_p6) target bundleno = 8 (0x8), region = 137 }
 0x4c5   :  { %1712 = vsyncpa [#allocation3], 1 }
 0x4c6   :  { %1714 = vsyncpa [#allocation3 + $0x1], 1 }
 0x4c7   :  { %1715 = vsyncpa [#allocation6], 1 }
 0x4c8   :  { %1716 = vsyncpa [#allocation4], 1 }
 0x4c9   :  { %1718 = vsyncpa [#allocation4 + $0x1], 1 }
 0x4ca   :  { %1719 = vsyncpa [#allocation10], 1 }
 0x4cb   :  { %1721 = vsyncpa [#allocation10 + $0x1], 1 }

</bundles_post_ra>
